<compile_context>
chip_gen: v7x
topology: tpu7x:2x2x1
jax: 0.10.0
libtpu: 0.0.40
codegen_flags: <defaults>
</compile_context>

<pallas_src>
import jax
import jax.numpy as jnp
from jax.experimental import pallas as pl
from jax.experimental.pallas import tpu as pltpu

# conv hyper-parameters from the PyTorch module
IN_C, OUT_C = 8, 10
KH, KW = 3, 5
SH, SW = 2, 1       # stride (H, W)
PH, PW = 4, 2       # padding (H, W)
DH, DW = 3, 1       # dilation (H, W)

OC_PAD = 128        # lane-dense padded output-channel width
KWC = KW * IN_C     # 40: fused (kw, c) contraction width per kh tap


def conv2d_pallas(x, w, b):
    """x: (N,C,H,W) f32, w: (OC,C,KH,KW) f32, b: (OC,) f32 -> (N,OC,OH,OW) f32."""
    N, C, H, W = x.shape
    OC = w.shape[0]
    assert C == IN_C and OC == OUT_C
    assert SW == 1 and DW == 1              # W taps are contiguous (used below)

    OH = (H + 2 * PH - DH * (KH - 1) - 1) // SH + 1
    OW = (W + 2 * PW - DW * (KW - 1) - 1) // SW + 1
    HP = H + 2 * PH                         # padded height
    M = N * OH * OW                         # output rows (no junk rows)
    assert OW % 8 == 0 and M % 8 == 0       # sublane-aligned row groups

    # Accumulator chunk over M: largest multiple-of-8 divisor of M <= 256 rows,
    # so the chunk accumulator (<=32 vregs) stays in the 64-vreg file.
    CH = 8
    for cand in range(min(M, 256), 7, -8):
        if M % cand == 0:
            CH = cand
            break

    # ---- tiny wrapper-side layout-only ops (each <= ~60 KB) ----------------
    x_nhwc = jnp.transpose(x, (0, 2, 3, 1)).astype(jnp.float32)      # (N,H,W,C)
    xp = jnp.pad(x_nhwc, ((0, 0), (PH, PH), (PW, PW), (0, 0)))       # (N,HP,W+2PW,C)
    # SW = DW = 1 => the W unfold is a static slice-concat (pure layout):
    # xu[n, h, ow, kw*C + c] = xp[n, h, ow + kw, c]
    xu = jnp.concatenate([xp[:, :, kw:kw + OW, :] for kw in range(KW)],
                         axis=-1)                                    # (N,HP,OW,KWC)

    # weights: w[oc, c, kh, kw] -> wt[kh, kw*C + c, oc], oc zero-padded to 128
    wt = jnp.transpose(w, (2, 3, 1, 0)).reshape(KH, KW * C, OC)
    wt = jnp.pad(wt, ((0, 0), (0, 0), (0, OC_PAD - OC))).astype(jnp.float32)
    bt = jnp.pad(b.reshape(1, OC), ((0, 0), (0, OC_PAD - OC))).astype(jnp.float32)

    def kernel(xu_ref, w_ref, b_ref, o_ref, xg_ref):
        # xu_ref: (N, HP, OW, KWC)   W-unfolded, zero-padded input
        # w_ref : (KH, KWC, OC_PAD)  per-kh fused-K weights (oc zero-padded)
        # b_ref : (1, OC_PAD)        bias (oc zero-padded)
        # o_ref : (M, OC_PAD)        row m = (n*OH + oh)*OW + ow
        # xg_ref: (KH, M, KWC)       im2col slab scratch (fully written below)

        # 1) strided (SH=2) + dilated (DH=3) H-gather into the im2col slab.
        #    Every copy is a whole (OW, KWC) = (16, 40) block whose destination
        #    rows start at a multiple of 16: sublane-aligned, unrotated stores,
        #    and the slab needs no zero-init (all rows/lanes are written).
        for n in range(N):
            for kh in range(KH):
                for oh in range(OH):
                    h = SH * oh + DH * kh            # index into pre-padded H
                    base = (n * OH + oh) * OW
                    xg_ref[kh, pl.ds(base, OW), :] = xu_ref[n, h, :, :]

        # 2) 3 fused-K (K = KW*C = 40) MXU matmuls per M-chunk.  The chunk
        #    accumulator stays in vregs, the bias is folded into the same pass,
        #    and each output row is written exactly once (no RMW through o_ref).
        for m0 in range(0, M, CH):
            acc = jnp.dot(xg_ref[0, pl.ds(m0, CH), :], w_ref[0],
                          preferred_element_type=jnp.float32)
            for kh in range(1, KH):
                acc += jnp.dot(xg_ref[kh, pl.ds(m0, CH), :], w_ref[kh],
                               preferred_element_type=jnp.float32)
            o_ref[pl.ds(m0, CH), :] = acc + b_ref[...]

    out2d = pl.pallas_call(
        kernel,
        out_shape=jax.ShapeDtypeStruct((M, OC_PAD), jnp.float32),
        grid_spec=pltpu.PrefetchScalarGridSpec(
            num_scalar_prefetch=0,
            grid=(1,),                                  # single program
            in_specs=[
                pl.BlockSpec((N, HP, OW, KWC), lambda i: (0, 0, 0, 0)),
                pl.BlockSpec((KH, KWC, OC_PAD), lambda i: (0, 0, 0)),
                pl.BlockSpec((1, OC_PAD), lambda i: (0, 0)),
            ],
            out_specs=pl.BlockSpec((M, OC_PAD), lambda i: (0, 0)),
            scratch_shapes=[pltpu.VMEM((KH, M, KWC), jnp.float32)],
        ),
        compiler_params=pltpu.CompilerParams(
            dimension_semantics=("arbitrary",),
        ),
    )(xu, wt, bt)

    # drop the OC padding and go back to NCHW (no junk rows to remove).
    out = out2d.reshape(N, OH, OW, OC_PAD)[..., :OC]
    return jnp.transpose(out, (0, 3, 1, 2))


if __name__ == "__main__":
    key = jax.random.PRNGKey(0)
    kx, kw_, kb = jax.random.split(key, 3)

    # shapes consistent with the module: batch=2, in_channels=8, spatial=16
    x = jax.random.normal(kx, (2, IN_C, 16, 16), dtype=jnp.float32)
    w = 0.1 * jax.random.normal(kw_, (OUT_C, IN_C, KH, KW), dtype=jnp.float32)
    b = 0.1 * jax.random.normal(kb, (OUT_C,), dtype=jnp.float32)

    out = jax.block_until_ready(jax.jit(conv2d_pallas)(x, w, b))

    # reference: XLA's dilated conv (same semantics as torch.nn.Conv2d) + bias
    ref = jax.lax.conv_general_dilated(
        x, w,
        window_strides=(SH, SW),
        padding=((PH, PH), (PW, PW)),
        rhs_dilation=(DH, DW),
        dimension_numbers=("NCHW", "OIHW", "NCHW"),
    ) + b[None, :, None, None]

    assert out.shape == ref.shape, (out.shape, ref.shape)
    err = float(jnp.max(jnp.abs(out - ref)))
    assert err < 1e-3, err
    print("KERNEL_OK")
</pallas_src>

<mosaic_0001>
module attributes {stable_mosaic.version = 11 : i64} {
  func.func @kernel(%arg0: i32, %arg1: memref<2x24x16x40xf32, #tpu.memory_space<vmem>>, %arg2: memref<3x40x128xf32, #tpu.memory_space<vmem>>, %arg3: memref<1x128xf32, #tpu.memory_space<vmem>>, %arg4: memref<288x128xf32, #tpu.memory_space<vmem>>, %arg5: memref<3x288x40xf32, #tpu.memory_space<vmem>>) attributes {dimension_semantics = [#tpu.dimension_semantics<arbitrary>], iteration_bounds = array<i64: 1>, scalar_prefetch = 0 : i64, scratch_operands = 1 : i64, tpu.core_type = #tpu.core_type<tc>, window_params = [{pipeline_mode = #tpu.pipeline_mode<synchronous>, transform_indices = @transform_0, window_bounds = array<i64: 2, 24, 16, 40>}, {pipeline_mode = #tpu.pipeline_mode<synchronous>, transform_indices = @transform_1, window_bounds = array<i64: 3, 40, 128>}, {pipeline_mode = #tpu.pipeline_mode<synchronous>, transform_indices = @transform_2, window_bounds = array<i64: 1, 128>}, {pipeline_mode = #tpu.pipeline_mode<synchronous>, transform_indices = @transform_3, window_bounds = array<i64: 288, 128>}]} {
    %c0 = arith.constant 0 : index
    %c0_0 = arith.constant 0 : index
    %c0_1 = arith.constant 0 : index
    %c0_2 = arith.constant 0 : index
    %0 = vector.load %arg1[%c0, %c0_0, %c0_1, %c0_2] : memref<2x24x16x40xf32, #tpu.memory_space<vmem>>, vector<1x1x16x40xf32>
    %1 = vector.shape_cast %0 : vector<1x1x16x40xf32> to vector<16x40xf32>
    %c0_3 = arith.constant 0 : index
    %c0_4 = arith.constant 0 : index
    %c0_5 = arith.constant 0 : index
    %2 = vector.load %arg5[%c0_3, %c0_4, %c0_5] : memref<3x288x40xf32, #tpu.memory_space<vmem>>, vector<1x16x40xf32>
    %3 = vector.shape_cast %2 : vector<1x16x40xf32> to vector<16x40xf32>
    %4 = vector.shape_cast %1 : vector<16x40xf32> to vector<1x16x40xf32>
    tpu.vector_store %arg5[%c0_3, %c0_4, %c0_5], %4 {strides = array<i32>} : memref<3x288x40xf32, #tpu.memory_space<vmem>>, vector<1x16x40xf32>,
    %c0_6 = arith.constant 0 : index
    %c2 = arith.constant 2 : index
    %c0_7 = arith.constant 0 : index
    %c0_8 = arith.constant 0 : index
    %5 = vector.load %arg1[%c0_6, %c2, %c0_7, %c0_8] : memref<2x24x16x40xf32, #tpu.memory_space<vmem>>, vector<1x1x16x40xf32>
    %6 = vector.shape_cast %5 : vector<1x1x16x40xf32> to vector<16x40xf32>
    %c0_9 = arith.constant 0 : index
    %c16 = arith.constant 16 : index
    %c0_10 = arith.constant 0 : index
    %7 = vector.load %arg5[%c0_9, %c16, %c0_10] : memref<3x288x40xf32, #tpu.memory_space<vmem>>, vector<1x16x40xf32>
    %8 = vector.shape_cast %7 : vector<1x16x40xf32> to vector<16x40xf32>
    %9 = vector.shape_cast %6 : vector<16x40xf32> to vector<1x16x40xf32>
    tpu.vector_store %arg5[%c0_9, %c16, %c0_10], %9 {strides = array<i32>} : memref<3x288x40xf32, #tpu.memory_space<vmem>>, vector<1x16x40xf32>,
    %c0_11 = arith.constant 0 : index
    %c4 = arith.constant 4 : index
    %c0_12 = arith.constant 0 : index
    %c0_13 = arith.constant 0 : index
    %10 = vector.load %arg1[%c0_11, %c4, %c0_12, %c0_13] : memref<2x24x16x40xf32, #tpu.memory_space<vmem>>, vector<1x1x16x40xf32>
    %11 = vector.shape_cast %10 : vector<1x1x16x40xf32> to vector<16x40xf32>
    %c0_14 = arith.constant 0 : index
    %c32 = arith.constant 32 : index
    %c0_15 = arith.constant 0 : index
    %12 = vector.load %arg5[%c0_14, %c32, %c0_15] : memref<3x288x40xf32, #tpu.memory_space<vmem>>, vector<1x16x40xf32>
    %13 = vector.shape_cast %12 : vector<1x16x40xf32> to vector<16x40xf32>
    %14 = vector.shape_cast %11 : vector<16x40xf32> to vector<1x16x40xf32>
    tpu.vector_store %arg5[%c0_14, %c32, %c0_15], %14 {strides = array<i32>} : memref<3x288x40xf32, #tpu.memory_space<vmem>>, vector<1x16x40xf32>,
    %c0_16 = arith.constant 0 : index
    %c6 = arith.constant 6 : index
    %c0_17 = arith.constant 0 : index
    %c0_18 = arith.constant 0 : index
    %15 = vector.load %arg1[%c0_16, %c6, %c0_17, %c0_18] : memref<2x24x16x40xf32, #tpu.memory_space<vmem>>, vector<1x1x16x40xf32>
    %16 = vector.shape_cast %15 : vector<1x1x16x40xf32> to vector<16x40xf32>
    %c0_19 = arith.constant 0 : index
    %c48 = arith.constant 48 : index
    %c0_20 = arith.constant 0 : index
    %17 = vector.load %arg5[%c0_19, %c48, %c0_20] : memref<3x288x40xf32, #tpu.memory_space<vmem>>, vector<1x16x40xf32>
    %18 = vector.shape_cast %17 : vector<1x16x40xf32> to vector<16x40xf32>
    %19 = vector.shape_cast %16 : vector<16x40xf32> to vector<1x16x40xf32>
    tpu.vector_store %arg5[%c0_19, %c48, %c0_20], %19 {strides = array<i32>} : memref<3x288x40xf32, #tpu.memory_space<vmem>>, vector<1x16x40xf32>,
    %c0_21 = arith.constant 0 : index
    %c8 = arith.constant 8 : index
    %c0_22 = arith.constant 0 : index
    %c0_23 = arith.constant 0 : index
    %20 = vector.load %arg1[%c0_21, %c8, %c0_22, %c0_23] : memref<2x24x16x40xf32, #tpu.memory_space<vmem>>, vector<1x1x16x40xf32>
    %21 = vector.shape_cast %20 : vector<1x1x16x40xf32> to vector<16x40xf32>
    %c0_24 = arith.constant 0 : index
    %c64 = arith.constant 64 : index
    %c0_25 = arith.constant 0 : index
    %22 = vector.load %arg5[%c0_24, %c64, %c0_25] : memref<3x288x40xf32, #tpu.memory_space<vmem>>, vector<1x16x40xf32>
    %23 = vector.shape_cast %22 : vector<1x16x40xf32> to vector<16x40xf32>
    %24 = vector.shape_cast %21 : vector<16x40xf32> to vector<1x16x40xf32>
    tpu.vector_store %arg5[%c0_24, %c64, %c0_25], %24 {strides = array<i32>} : memref<3x288x40xf32, #tpu.memory_space<vmem>>, vector<1x16x40xf32>,
    %c0_26 = arith.constant 0 : index
    %c10 = arith.constant 10 : index
    %c0_27 = arith.constant 0 : index
    %c0_28 = arith.constant 0 : index
    %25 = vector.load %arg1[%c0_26, %c10, %c0_27, %c0_28] : memref<2x24x16x40xf32, #tpu.memory_space<vmem>>, vector<1x1x16x40xf32>
    %26 = vector.shape_cast %25 : vector<1x1x16x40xf32> to vector<16x40xf32>
    %c0_29 = arith.constant 0 : index
    %c80 = arith.constant 80 : index
    %c0_30 = arith.constant 0 : index
    %27 = vector.load %arg5[%c0_29, %c80, %c0_30] : memref<3x288x40xf32, #tpu.memory_space<vmem>>, vector<1x16x40xf32>
    %28 = vector.shape_cast %27 : vector<1x16x40xf32> to vector<16x40xf32>
    %29 = vector.shape_cast %26 : vector<16x40xf32> to vector<1x16x40xf32>
    tpu.vector_store %arg5[%c0_29, %c80, %c0_30], %29 {strides = array<i32>} : memref<3x288x40xf32, #tpu.memory_space<vmem>>, vector<1x16x40xf32>,
    %c0_31 = arith.constant 0 : index
    %c12 = arith.constant 12 : index
    %c0_32 = arith.constant 0 : index
    %c0_33 = arith.constant 0 : index
    %30 = vector.load %arg1[%c0_31, %c12, %c0_32, %c0_33] : memref<2x24x16x40xf32, #tpu.memory_space<vmem>>, vector<1x1x16x40xf32>
    %31 = vector.shape_cast %30 : vector<1x1x16x40xf32> to vector<16x40xf32>
    %c0_34 = arith.constant 0 : index
    %c96 = arith.constant 96 : index
    %c0_35 = arith.constant 0 : index
    %32 = vector.load %arg5[%c0_34, %c96, %c0_35] : memref<3x288x40xf32, #tpu.memory_space<vmem>>, vector<1x16x40xf32>
    %33 = vector.shape_cast %32 : vector<1x16x40xf32> to vector<16x40xf32>
    %34 = vector.shape_cast %31 : vector<16x40xf32> to vector<1x16x40xf32>
    tpu.vector_store %arg5[%c0_34, %c96, %c0_35], %34 {strides = array<i32>} : memref<3x288x40xf32, #tpu.memory_space<vmem>>, vector<1x16x40xf32>,
    %c0_36 = arith.constant 0 : index
    %c14 = arith.constant 14 : index
    %c0_37 = arith.constant 0 : index
    %c0_38 = arith.constant 0 : index
    %35 = vector.load %arg1[%c0_36, %c14, %c0_37, %c0_38] : memref<2x24x16x40xf32, #tpu.memory_space<vmem>>, vector<1x1x16x40xf32>
    %36 = vector.shape_cast %35 : vector<1x1x16x40xf32> to vector<16x40xf32>
    %c0_39 = arith.constant 0 : index
    %c112 = arith.constant 112 : index
    %c0_40 = arith.constant 0 : index
    %37 = vector.load %arg5[%c0_39, %c112, %c0_40] : memref<3x288x40xf32, #tpu.memory_space<vmem>>, vector<1x16x40xf32>
    %38 = vector.shape_cast %37 : vector<1x16x40xf32> to vector<16x40xf32>
    %39 = vector.shape_cast %36 : vector<16x40xf32> to vector<1x16x40xf32>
    tpu.vector_store %arg5[%c0_39, %c112, %c0_40], %39 {strides = array<i32>} : memref<3x288x40xf32, #tpu.memory_space<vmem>>, vector<1x16x40xf32>,
    %c0_41 = arith.constant 0 : index
    %c16_42 = arith.constant 16 : index
    %c0_43 = arith.constant 0 : index
    %c0_44 = arith.constant 0 : index
    %40 = vector.load %arg1[%c0_41, %c16_42, %c0_43, %c0_44] : memref<2x24x16x40xf32, #tpu.memory_space<vmem>>, vector<1x1x16x40xf32>
    %41 = vector.shape_cast %40 : vector<1x1x16x40xf32> to vector<16x40xf32>
    %c0_45 = arith.constant 0 : index
    %c128 = arith.constant 128 : index
    %c0_46 = arith.constant 0 : index
    %42 = vector.load %arg5[%c0_45, %c128, %c0_46] : memref<3x288x40xf32, #tpu.memory_space<vmem>>, vector<1x16x40xf32>
    %43 = vector.shape_cast %42 : vector<1x16x40xf32> to vector<16x40xf32>
    %44 = vector.shape_cast %41 : vector<16x40xf32> to vector<1x16x40xf32>
    tpu.vector_store %arg5[%c0_45, %c128, %c0_46], %44 {strides = array<i32>} : memref<3x288x40xf32, #tpu.memory_space<vmem>>, vector<1x16x40xf32>,
    %c0_47 = arith.constant 0 : index
    %c3 = arith.constant 3 : index
    %c0_48 = arith.constant 0 : index
    %c0_49 = arith.constant 0 : index
    %45 = vector.load %arg1[%c0_47, %c3, %c0_48, %c0_49] : memref<2x24x16x40xf32, #tpu.memory_space<vmem>>, vector<1x1x16x40xf32>
    %46 = vector.shape_cast %45 : vector<1x1x16x40xf32> to vector<16x40xf32>
    %c1 = arith.constant 1 : index
    %c0_50 = arith.constant 0 : index
    %c0_51 = arith.constant 0 : index
    %47 = vector.load %arg5[%c1, %c0_50, %c0_51] : memref<3x288x40xf32, #tpu.memory_space<vmem>>, vector<1x16x40xf32>
    %48 = vector.shape_cast %47 : vector<1x16x40xf32> to vector<16x40xf32>
    %49 = vector.shape_cast %46 : vector<16x40xf32> to vector<1x16x40xf32>
    tpu.vector_store %arg5[%c1, %c0_50, %c0_51], %49 {strides = array<i32>} : memref<3x288x40xf32, #tpu.memory_space<vmem>>, vector<1x16x40xf32>,
    %c0_52 = arith.constant 0 : index
    %c5 = arith.constant 5 : index
    %c0_53 = arith.constant 0 : index
    %c0_54 = arith.constant 0 : index
    %50 = vector.load %arg1[%c0_52, %c5, %c0_53, %c0_54] : memref<2x24x16x40xf32, #tpu.memory_space<vmem>>, vector<1x1x16x40xf32>
    %51 = vector.shape_cast %50 : vector<1x1x16x40xf32> to vector<16x40xf32>
    %c1_55 = arith.constant 1 : index
    %c16_56 = arith.constant 16 : index
    %c0_57 = arith.constant 0 : index
    %52 = vector.load %arg5[%c1_55, %c16_56, %c0_57] : memref<3x288x40xf32, #tpu.memory_space<vmem>>, vector<1x16x40xf32>
    %53 = vector.shape_cast %52 : vector<1x16x40xf32> to vector<16x40xf32>
    %54 = vector.shape_cast %51 : vector<16x40xf32> to vector<1x16x40xf32>
    tpu.vector_store %arg5[%c1_55, %c16_56, %c0_57], %54 {strides = array<i32>} : memref<3x288x40xf32, #tpu.memory_space<vmem>>, vector<1x16x40xf32>,
    %c0_58 = arith.constant 0 : index
    %c7 = arith.constant 7 : index
    %c0_59 = arith.constant 0 : index
    %c0_60 = arith.constant 0 : index
    %55 = vector.load %arg1[%c0_58, %c7, %c0_59, %c0_60] : memref<2x24x16x40xf32, #tpu.memory_space<vmem>>, vector<1x1x16x40xf32>
    %56 = vector.shape_cast %55 : vector<1x1x16x40xf32> to vector<16x40xf32>
    %c1_61 = arith.constant 1 : index
    %c32_62 = arith.constant 32 : index
    %c0_63 = arith.constant 0 : index
    %57 = vector.load %arg5[%c1_61, %c32_62, %c0_63] : memref<3x288x40xf32, #tpu.memory_space<vmem>>, vector<1x16x40xf32>
    %58 = vector.shape_cast %57 : vector<1x16x40xf32> to vector<16x40xf32>
    %59 = vector.shape_cast %56 : vector<16x40xf32> to vector<1x16x40xf32>
    tpu.vector_store %arg5[%c1_61, %c32_62, %c0_63], %59 {strides = array<i32>} : memref<3x288x40xf32, #tpu.memory_space<vmem>>, vector<1x16x40xf32>,
    %c0_64 = arith.constant 0 : index
    %c9 = arith.constant 9 : index
    %c0_65 = arith.constant 0 : index
    %c0_66 = arith.constant 0 : index
    %60 = vector.load %arg1[%c0_64, %c9, %c0_65, %c0_66] : memref<2x24x16x40xf32, #tpu.memory_space<vmem>>, vector<1x1x16x40xf32>
    %61 = vector.shape_cast %60 : vector<1x1x16x40xf32> to vector<16x40xf32>
    %c1_67 = arith.constant 1 : index
    %c48_68 = arith.constant 48 : index
    %c0_69 = arith.constant 0 : index
    %62 = vector.load %arg5[%c1_67, %c48_68, %c0_69] : memref<3x288x40xf32, #tpu.memory_space<vmem>>, vector<1x16x40xf32>
    %63 = vector.shape_cast %62 : vector<1x16x40xf32> to vector<16x40xf32>
    %64 = vector.shape_cast %61 : vector<16x40xf32> to vector<1x16x40xf32>
    tpu.vector_store %arg5[%c1_67, %c48_68, %c0_69], %64 {strides = array<i32>} : memref<3x288x40xf32, #tpu.memory_space<vmem>>, vector<1x16x40xf32>,
    %c0_70 = arith.constant 0 : index
    %c11 = arith.constant 11 : index
    %c0_71 = arith.constant 0 : index
    %c0_72 = arith.constant 0 : index
    %65 = vector.load %arg1[%c0_70, %c11, %c0_71, %c0_72] : memref<2x24x16x40xf32, #tpu.memory_space<vmem>>, vector<1x1x16x40xf32>
    %66 = vector.shape_cast %65 : vector<1x1x16x40xf32> to vector<16x40xf32>
    %c1_73 = arith.constant 1 : index
    %c64_74 = arith.constant 64 : index
    %c0_75 = arith.constant 0 : index
    %67 = vector.load %arg5[%c1_73, %c64_74, %c0_75] : memref<3x288x40xf32, #tpu.memory_space<vmem>>, vector<1x16x40xf32>
    %68 = vector.shape_cast %67 : vector<1x16x40xf32> to vector<16x40xf32>
    %69 = vector.shape_cast %66 : vector<16x40xf32> to vector<1x16x40xf32>
    tpu.vector_store %arg5[%c1_73, %c64_74, %c0_75], %69 {strides = array<i32>} : memref<3x288x40xf32, #tpu.memory_space<vmem>>, vector<1x16x40xf32>,
    %c0_76 = arith.constant 0 : index
    %c13 = arith.constant 13 : index
    %c0_77 = arith.constant 0 : index
    %c0_78 = arith.constant 0 : index
    %70 = vector.load %arg1[%c0_76, %c13, %c0_77, %c0_78] : memref<2x24x16x40xf32, #tpu.memory_space<vmem>>, vector<1x1x16x40xf32>
    %71 = vector.shape_cast %70 : vector<1x1x16x40xf32> to vector<16x40xf32>
    %c1_79 = arith.constant 1 : index
    %c80_80 = arith.constant 80 : index
    %c0_81 = arith.constant 0 : index
    %72 = vector.load %arg5[%c1_79, %c80_80, %c0_81] : memref<3x288x40xf32, #tpu.memory_space<vmem>>, vector<1x16x40xf32>
    %73 = vector.shape_cast %72 : vector<1x16x40xf32> to vector<16x40xf32>
    %74 = vector.shape_cast %71 : vector<16x40xf32> to vector<1x16x40xf32>
    tpu.vector_store %arg5[%c1_79, %c80_80, %c0_81], %74 {strides = array<i32>} : memref<3x288x40xf32, #tpu.memory_space<vmem>>, vector<1x16x40xf32>,
    %c0_82 = arith.constant 0 : index
    %c15 = arith.constant 15 : index
    %c0_83 = arith.constant 0 : index
    %c0_84 = arith.constant 0 : index
    %75 = vector.load %arg1[%c0_82, %c15, %c0_83, %c0_84] : memref<2x24x16x40xf32, #tpu.memory_space<vmem>>, vector<1x1x16x40xf32>
    %76 = vector.shape_cast %75 : vector<1x1x16x40xf32> to vector<16x40xf32>
    %c1_85 = arith.constant 1 : index
    %c96_86 = arith.constant 96 : index
    %c0_87 = arith.constant 0 : index
    %77 = vector.load %arg5[%c1_85, %c96_86, %c0_87] : memref<3x288x40xf32, #tpu.memory_space<vmem>>, vector<1x16x40xf32>
    %78 = vector.shape_cast %77 : vector<1x16x40xf32> to vector<16x40xf32>
    %79 = vector.shape_cast %76 : vector<16x40xf32> to vector<1x16x40xf32>
    tpu.vector_store %arg5[%c1_85, %c96_86, %c0_87], %79 {strides = array<i32>} : memref<3x288x40xf32, #tpu.memory_space<vmem>>, vector<1x16x40xf32>,
    %c0_88 = arith.constant 0 : index
    %c17 = arith.constant 17 : index
    %c0_89 = arith.constant 0 : index
    %c0_90 = arith.constant 0 : index
    %80 = vector.load %arg1[%c0_88, %c17, %c0_89, %c0_90] : memref<2x24x16x40xf32, #tpu.memory_space<vmem>>, vector<1x1x16x40xf32>
    %81 = vector.shape_cast %80 : vector<1x1x16x40xf32> to vector<16x40xf32>
    %c1_91 = arith.constant 1 : index
    %c112_92 = arith.constant 112 : index
    %c0_93 = arith.constant 0 : index
    %82 = vector.load %arg5[%c1_91, %c112_92, %c0_93] : memref<3x288x40xf32, #tpu.memory_space<vmem>>, vector<1x16x40xf32>
    %83 = vector.shape_cast %82 : vector<1x16x40xf32> to vector<16x40xf32>
    %84 = vector.shape_cast %81 : vector<16x40xf32> to vector<1x16x40xf32>
    tpu.vector_store %arg5[%c1_91, %c112_92, %c0_93], %84 {strides = array<i32>} : memref<3x288x40xf32, #tpu.memory_space<vmem>>, vector<1x16x40xf32>,
    %c0_94 = arith.constant 0 : index
    %c19 = arith.constant 19 : index
    %c0_95 = arith.constant 0 : index
    %c0_96 = arith.constant 0 : index
    %85 = vector.load %arg1[%c0_94, %c19, %c0_95, %c0_96] : memref<2x24x16x40xf32, #tpu.memory_space<vmem>>, vector<1x1x16x40xf32>
    %86 = vector.shape_cast %85 : vector<1x1x16x40xf32> to vector<16x40xf32>
    %c1_97 = arith.constant 1 : index
    %c128_98 = arith.constant 128 : index
    %c0_99 = arith.constant 0 : index
    %87 = vector.load %arg5[%c1_97, %c128_98, %c0_99] : memref<3x288x40xf32, #tpu.memory_space<vmem>>, vector<1x16x40xf32>
    %88 = vector.shape_cast %87 : vector<1x16x40xf32> to vector<16x40xf32>
    %89 = vector.shape_cast %86 : vector<16x40xf32> to vector<1x16x40xf32>
    tpu.vector_store %arg5[%c1_97, %c128_98, %c0_99], %89 {strides = array<i32>} : memref<3x288x40xf32, #tpu.memory_space<vmem>>, vector<1x16x40xf32>,
    %c0_100 = arith.constant 0 : index
    %c6_101 = arith.constant 6 : index
    %c0_102 = arith.constant 0 : index
    %c0_103 = arith.constant 0 : index
    %90 = vector.load %arg1[%c0_100, %c6_101, %c0_102, %c0_103] : memref<2x24x16x40xf32, #tpu.memory_space<vmem>>, vector<1x1x16x40xf32>
    %91 = vector.shape_cast %90 : vector<1x1x16x40xf32> to vector<16x40xf32>
    %c2_104 = arith.constant 2 : index
    %c0_105 = arith.constant 0 : index
    %c0_106 = arith.constant 0 : index
    %92 = vector.load %arg5[%c2_104, %c0_105, %c0_106] : memref<3x288x40xf32, #tpu.memory_space<vmem>>, vector<1x16x40xf32>
    %93 = vector.shape_cast %92 : vector<1x16x40xf32> to vector<16x40xf32>
    %94 = vector.shape_cast %91 : vector<16x40xf32> to vector<1x16x40xf32>
    tpu.vector_store %arg5[%c2_104, %c0_105, %c0_106], %94 {strides = array<i32>} : memref<3x288x40xf32, #tpu.memory_space<vmem>>, vector<1x16x40xf32>,
    %c0_107 = arith.constant 0 : index
    %c8_108 = arith.constant 8 : index
    %c0_109 = arith.constant 0 : index
    %c0_110 = arith.constant 0 : index
    %95 = vector.load %arg1[%c0_107, %c8_108, %c0_109, %c0_110] : memref<2x24x16x40xf32, #tpu.memory_space<vmem>>, vector<1x1x16x40xf32>
    %96 = vector.shape_cast %95 : vector<1x1x16x40xf32> to vector<16x40xf32>
    %c2_111 = arith.constant 2 : index
    %c16_112 = arith.constant 16 : index
    %c0_113 = arith.constant 0 : index
    %97 = vector.load %arg5[%c2_111, %c16_112, %c0_113] : memref<3x288x40xf32, #tpu.memory_space<vmem>>, vector<1x16x40xf32>
    %98 = vector.shape_cast %97 : vector<1x16x40xf32> to vector<16x40xf32>
    %99 = vector.shape_cast %96 : vector<16x40xf32> to vector<1x16x40xf32>
    tpu.vector_store %arg5[%c2_111, %c16_112, %c0_113], %99 {strides = array<i32>} : memref<3x288x40xf32, #tpu.memory_space<vmem>>, vector<1x16x40xf32>,
    %c0_114 = arith.constant 0 : index
    %c10_115 = arith.constant 10 : index
    %c0_116 = arith.constant 0 : index
    %c0_117 = arith.constant 0 : index
    %100 = vector.load %arg1[%c0_114, %c10_115, %c0_116, %c0_117] : memref<2x24x16x40xf32, #tpu.memory_space<vmem>>, vector<1x1x16x40xf32>
    %101 = vector.shape_cast %100 : vector<1x1x16x40xf32> to vector<16x40xf32>
    %c2_118 = arith.constant 2 : index
    %c32_119 = arith.constant 32 : index
    %c0_120 = arith.constant 0 : index
    %102 = vector.load %arg5[%c2_118, %c32_119, %c0_120] : memref<3x288x40xf32, #tpu.memory_space<vmem>>, vector<1x16x40xf32>
    %103 = vector.shape_cast %102 : vector<1x16x40xf32> to vector<16x40xf32>
    %104 = vector.shape_cast %101 : vector<16x40xf32> to vector<1x16x40xf32>
    tpu.vector_store %arg5[%c2_118, %c32_119, %c0_120], %104 {strides = array<i32>} : memref<3x288x40xf32, #tpu.memory_space<vmem>>, vector<1x16x40xf32>,
    %c0_121 = arith.constant 0 : index
    %c12_122 = arith.constant 12 : index
    %c0_123 = arith.constant 0 : index
    %c0_124 = arith.constant 0 : index
    %105 = vector.load %arg1[%c0_121, %c12_122, %c0_123, %c0_124] : memref<2x24x16x40xf32, #tpu.memory_space<vmem>>, vector<1x1x16x40xf32>
    %106 = vector.shape_cast %105 : vector<1x1x16x40xf32> to vector<16x40xf32>
    %c2_125 = arith.constant 2 : index
    %c48_126 = arith.constant 48 : index
    %c0_127 = arith.constant 0 : index
    %107 = vector.load %arg5[%c2_125, %c48_126, %c0_127] : memref<3x288x40xf32, #tpu.memory_space<vmem>>, vector<1x16x40xf32>
    %108 = vector.shape_cast %107 : vector<1x16x40xf32> to vector<16x40xf32>
    %109 = vector.shape_cast %106 : vector<16x40xf32> to vector<1x16x40xf32>
    tpu.vector_store %arg5[%c2_125, %c48_126, %c0_127], %109 {strides = array<i32>} : memref<3x288x40xf32, #tpu.memory_space<vmem>>, vector<1x16x40xf32>,
    %c0_128 = arith.constant 0 : index
    %c14_129 = arith.constant 14 : index
    %c0_130 = arith.constant 0 : index
    %c0_131 = arith.constant 0 : index
    %110 = vector.load %arg1[%c0_128, %c14_129, %c0_130, %c0_131] : memref<2x24x16x40xf32, #tpu.memory_space<vmem>>, vector<1x1x16x40xf32>
    %111 = vector.shape_cast %110 : vector<1x1x16x40xf32> to vector<16x40xf32>
    %c2_132 = arith.constant 2 : index
    %c64_133 = arith.constant 64 : index
    %c0_134 = arith.constant 0 : index
    %112 = vector.load %arg5[%c2_132, %c64_133, %c0_134] : memref<3x288x40xf32, #tpu.memory_space<vmem>>, vector<1x16x40xf32>
    %113 = vector.shape_cast %112 : vector<1x16x40xf32> to vector<16x40xf32>
    %114 = vector.shape_cast %111 : vector<16x40xf32> to vector<1x16x40xf32>
    tpu.vector_store %arg5[%c2_132, %c64_133, %c0_134], %114 {strides = array<i32>} : memref<3x288x40xf32, #tpu.memory_space<vmem>>, vector<1x16x40xf32>,
    %c0_135 = arith.constant 0 : index
    %c16_136 = arith.constant 16 : index
    %c0_137 = arith.constant 0 : index
    %c0_138 = arith.constant 0 : index
    %115 = vector.load %arg1[%c0_135, %c16_136, %c0_137, %c0_138] : memref<2x24x16x40xf32, #tpu.memory_space<vmem>>, vector<1x1x16x40xf32>
    %116 = vector.shape_cast %115 : vector<1x1x16x40xf32> to vector<16x40xf32>
    %c2_139 = arith.constant 2 : index
    %c80_140 = arith.constant 80 : index
    %c0_141 = arith.constant 0 : index
    %117 = vector.load %arg5[%c2_139, %c80_140, %c0_141] : memref<3x288x40xf32, #tpu.memory_space<vmem>>, vector<1x16x40xf32>
    %118 = vector.shape_cast %117 : vector<1x16x40xf32> to vector<16x40xf32>
    %119 = vector.shape_cast %116 : vector<16x40xf32> to vector<1x16x40xf32>
    tpu.vector_store %arg5[%c2_139, %c80_140, %c0_141], %119 {strides = array<i32>} : memref<3x288x40xf32, #tpu.memory_space<vmem>>, vector<1x16x40xf32>,
    %c0_142 = arith.constant 0 : index
    %c18 = arith.constant 18 : index
    %c0_143 = arith.constant 0 : index
    %c0_144 = arith.constant 0 : index
    %120 = vector.load %arg1[%c0_142, %c18, %c0_143, %c0_144] : memref<2x24x16x40xf32, #tpu.memory_space<vmem>>, vector<1x1x16x40xf32>
    %121 = vector.shape_cast %120 : vector<1x1x16x40xf32> to vector<16x40xf32>
    %c2_145 = arith.constant 2 : index
    %c96_146 = arith.constant 96 : index
    %c0_147 = arith.constant 0 : index
    %122 = vector.load %arg5[%c2_145, %c96_146, %c0_147] : memref<3x288x40xf32, #tpu.memory_space<vmem>>, vector<1x16x40xf32>
    %123 = vector.shape_cast %122 : vector<1x16x40xf32> to vector<16x40xf32>
    %124 = vector.shape_cast %121 : vector<16x40xf32> to vector<1x16x40xf32>
    tpu.vector_store %arg5[%c2_145, %c96_146, %c0_147], %124 {strides = array<i32>} : memref<3x288x40xf32, #tpu.memory_space<vmem>>, vector<1x16x40xf32>,
    %c0_148 = arith.constant 0 : index
    %c20 = arith.constant 20 : index
    %c0_149 = arith.constant 0 : index
    %c0_150 = arith.constant 0 : index
    %125 = vector.load %arg1[%c0_148, %c20, %c0_149, %c0_150] : memref<2x24x16x40xf32, #tpu.memory_space<vmem>>, vector<1x1x16x40xf32>
    %126 = vector.shape_cast %125 : vector<1x1x16x40xf32> to vector<16x40xf32>
    %c2_151 = arith.constant 2 : index
    %c112_152 = arith.constant 112 : index
    %c0_153 = arith.constant 0 : index
    %127 = vector.load %arg5[%c2_151, %c112_152, %c0_153] : memref<3x288x40xf32, #tpu.memory_space<vmem>>, vector<1x16x40xf32>
    %128 = vector.shape_cast %127 : vector<1x16x40xf32> to vector<16x40xf32>
    %129 = vector.shape_cast %126 : vector<16x40xf32> to vector<1x16x40xf32>
    tpu.vector_store %arg5[%c2_151, %c112_152, %c0_153], %129 {strides = array<i32>} : memref<3x288x40xf32, #tpu.memory_space<vmem>>, vector<1x16x40xf32>,
    %c0_154 = arith.constant 0 : index
    %c22 = arith.constant 22 : index
    %c0_155 = arith.constant 0 : index
    %c0_156 = arith.constant 0 : index
    %130 = vector.load %arg1[%c0_154, %c22, %c0_155, %c0_156] : memref<2x24x16x40xf32, #tpu.memory_space<vmem>>, vector<1x1x16x40xf32>
    %131 = vector.shape_cast %130 : vector<1x1x16x40xf32> to vector<16x40xf32>
    %c2_157 = arith.constant 2 : index
    %c128_158 = arith.constant 128 : index
    %c0_159 = arith.constant 0 : index
    %132 = vector.load %arg5[%c2_157, %c128_158, %c0_159] : memref<3x288x40xf32, #tpu.memory_space<vmem>>, vector<1x16x40xf32>
    %133 = vector.shape_cast %132 : vector<1x16x40xf32> to vector<16x40xf32>
    %134 = vector.shape_cast %131 : vector<16x40xf32> to vector<1x16x40xf32>
    tpu.vector_store %arg5[%c2_157, %c128_158, %c0_159], %134 {strides = array<i32>} : memref<3x288x40xf32, #tpu.memory_space<vmem>>, vector<1x16x40xf32>,
    %c1_160 = arith.constant 1 : index
    %c0_161 = arith.constant 0 : index
    %c0_162 = arith.constant 0 : index
    %c0_163 = arith.constant 0 : index
    %135 = vector.load %arg1[%c1_160, %c0_161, %c0_162, %c0_163] : memref<2x24x16x40xf32, #tpu.memory_space<vmem>>, vector<1x1x16x40xf32>
    %136 = vector.shape_cast %135 : vector<1x1x16x40xf32> to vector<16x40xf32>
    %c0_164 = arith.constant 0 : index
    %c144 = arith.constant 144 : index
    %c0_165 = arith.constant 0 : index
    %137 = vector.load %arg5[%c0_164, %c144, %c0_165] : memref<3x288x40xf32, #tpu.memory_space<vmem>>, vector<1x16x40xf32>
    %138 = vector.shape_cast %137 : vector<1x16x40xf32> to vector<16x40xf32>
    %139 = vector.shape_cast %136 : vector<16x40xf32> to vector<1x16x40xf32>
    tpu.vector_store %arg5[%c0_164, %c144, %c0_165], %139 {strides = array<i32>} : memref<3x288x40xf32, #tpu.memory_space<vmem>>, vector<1x16x40xf32>,
    %c1_166 = arith.constant 1 : index
    %c2_167 = arith.constant 2 : index
    %c0_168 = arith.constant 0 : index
    %c0_169 = arith.constant 0 : index
    %140 = vector.load %arg1[%c1_166, %c2_167, %c0_168, %c0_169] : memref<2x24x16x40xf32, #tpu.memory_space<vmem>>, vector<1x1x16x40xf32>
    %141 = vector.shape_cast %140 : vector<1x1x16x40xf32> to vector<16x40xf32>
    %c0_170 = arith.constant 0 : index
    %c160 = arith.constant 160 : index
    %c0_171 = arith.constant 0 : index
    %142 = vector.load %arg5[%c0_170, %c160, %c0_171] : memref<3x288x40xf32, #tpu.memory_space<vmem>>, vector<1x16x40xf32>
    %143 = vector.shape_cast %142 : vector<1x16x40xf32> to vector<16x40xf32>
    %144 = vector.shape_cast %141 : vector<16x40xf32> to vector<1x16x40xf32>
    tpu.vector_store %arg5[%c0_170, %c160, %c0_171], %144 {strides = array<i32>} : memref<3x288x40xf32, #tpu.memory_space<vmem>>, vector<1x16x40xf32>,
    %c1_172 = arith.constant 1 : index
    %c4_173 = arith.constant 4 : index
    %c0_174 = arith.constant 0 : index
    %c0_175 = arith.constant 0 : index
    %145 = vector.load %arg1[%c1_172, %c4_173, %c0_174, %c0_175] : memref<2x24x16x40xf32, #tpu.memory_space<vmem>>, vector<1x1x16x40xf32>
    %146 = vector.shape_cast %145 : vector<1x1x16x40xf32> to vector<16x40xf32>
    %c0_176 = arith.constant 0 : index
    %c176 = arith.constant 176 : index
    %c0_177 = arith.constant 0 : index
    %147 = vector.load %arg5[%c0_176, %c176, %c0_177] : memref<3x288x40xf32, #tpu.memory_space<vmem>>, vector<1x16x40xf32>
    %148 = vector.shape_cast %147 : vector<1x16x40xf32> to vector<16x40xf32>
    %149 = vector.shape_cast %146 : vector<16x40xf32> to vector<1x16x40xf32>
    tpu.vector_store %arg5[%c0_176, %c176, %c0_177], %149 {strides = array<i32>} : memref<3x288x40xf32, #tpu.memory_space<vmem>>, vector<1x16x40xf32>,
    %c1_178 = arith.constant 1 : index
    %c6_179 = arith.constant 6 : index
    %c0_180 = arith.constant 0 : index
    %c0_181 = arith.constant 0 : index
    %150 = vector.load %arg1[%c1_178, %c6_179, %c0_180, %c0_181] : memref<2x24x16x40xf32, #tpu.memory_space<vmem>>, vector<1x1x16x40xf32>
    %151 = vector.shape_cast %150 : vector<1x1x16x40xf32> to vector<16x40xf32>
    %c0_182 = arith.constant 0 : index
    %c192 = arith.constant 192 : index
    %c0_183 = arith.constant 0 : index
    %152 = vector.load %arg5[%c0_182, %c192, %c0_183] : memref<3x288x40xf32, #tpu.memory_space<vmem>>, vector<1x16x40xf32>
    %153 = vector.shape_cast %152 : vector<1x16x40xf32> to vector<16x40xf32>
    %154 = vector.shape_cast %151 : vector<16x40xf32> to vector<1x16x40xf32>
    tpu.vector_store %arg5[%c0_182, %c192, %c0_183], %154 {strides = array<i32>} : memref<3x288x40xf32, #tpu.memory_space<vmem>>, vector<1x16x40xf32>,
    %c1_184 = arith.constant 1 : index
    %c8_185 = arith.constant 8 : index
    %c0_186 = arith.constant 0 : index
    %c0_187 = arith.constant 0 : index
    %155 = vector.load %arg1[%c1_184, %c8_185, %c0_186, %c0_187] : memref<2x24x16x40xf32, #tpu.memory_space<vmem>>, vector<1x1x16x40xf32>
    %156 = vector.shape_cast %155 : vector<1x1x16x40xf32> to vector<16x40xf32>
    %c0_188 = arith.constant 0 : index
    %c208 = arith.constant 208 : index
    %c0_189 = arith.constant 0 : index
    %157 = vector.load %arg5[%c0_188, %c208, %c0_189] : memref<3x288x40xf32, #tpu.memory_space<vmem>>, vector<1x16x40xf32>
    %158 = vector.shape_cast %157 : vector<1x16x40xf32> to vector<16x40xf32>
    %159 = vector.shape_cast %156 : vector<16x40xf32> to vector<1x16x40xf32>
    tpu.vector_store %arg5[%c0_188, %c208, %c0_189], %159 {strides = array<i32>} : memref<3x288x40xf32, #tpu.memory_space<vmem>>, vector<1x16x40xf32>,
    %c1_190 = arith.constant 1 : index
    %c10_191 = arith.constant 10 : index
    %c0_192 = arith.constant 0 : index
    %c0_193 = arith.constant 0 : index
    %160 = vector.load %arg1[%c1_190, %c10_191, %c0_192, %c0_193] : memref<2x24x16x40xf32, #tpu.memory_space<vmem>>, vector<1x1x16x40xf32>
    %161 = vector.shape_cast %160 : vector<1x1x16x40xf32> to vector<16x40xf32>
    %c0_194 = arith.constant 0 : index
    %c224 = arith.constant 224 : index
    %c0_195 = arith.constant 0 : index
    %162 = vector.load %arg5[%c0_194, %c224, %c0_195] : memref<3x288x40xf32, #tpu.memory_space<vmem>>, vector<1x16x40xf32>
    %163 = vector.shape_cast %162 : vector<1x16x40xf32> to vector<16x40xf32>
    %164 = vector.shape_cast %161 : vector<16x40xf32> to vector<1x16x40xf32>
    tpu.vector_store %arg5[%c0_194, %c224, %c0_195], %164 {strides = array<i32>} : memref<3x288x40xf32, #tpu.memory_space<vmem>>, vector<1x16x40xf32>,
    %c1_196 = arith.constant 1 : index
    %c12_197 = arith.constant 12 : index
    %c0_198 = arith.constant 0 : index
    %c0_199 = arith.constant 0 : index
    %165 = vector.load %arg1[%c1_196, %c12_197, %c0_198, %c0_199] : memref<2x24x16x40xf32, #tpu.memory_space<vmem>>, vector<1x1x16x40xf32>
    %166 = vector.shape_cast %165 : vector<1x1x16x40xf32> to vector<16x40xf32>
    %c0_200 = arith.constant 0 : index
    %c240 = arith.constant 240 : index
    %c0_201 = arith.constant 0 : index
    %167 = vector.load %arg5[%c0_200, %c240, %c0_201] : memref<3x288x40xf32, #tpu.memory_space<vmem>>, vector<1x16x40xf32>
    %168 = vector.shape_cast %167 : vector<1x16x40xf32> to vector<16x40xf32>
    %169 = vector.shape_cast %166 : vector<16x40xf32> to vector<1x16x40xf32>
    tpu.vector_store %arg5[%c0_200, %c240, %c0_201], %169 {strides = array<i32>} : memref<3x288x40xf32, #tpu.memory_space<vmem>>, vector<1x16x40xf32>,
    %c1_202 = arith.constant 1 : index
    %c14_203 = arith.constant 14 : index
    %c0_204 = arith.constant 0 : index
    %c0_205 = arith.constant 0 : index
    %170 = vector.load %arg1[%c1_202, %c14_203, %c0_204, %c0_205] : memref<2x24x16x40xf32, #tpu.memory_space<vmem>>, vector<1x1x16x40xf32>
    %171 = vector.shape_cast %170 : vector<1x1x16x40xf32> to vector<16x40xf32>
    %c0_206 = arith.constant 0 : index
    %c256 = arith.constant 256 : index
    %c0_207 = arith.constant 0 : index
    %172 = vector.load %arg5[%c0_206, %c256, %c0_207] : memref<3x288x40xf32, #tpu.memory_space<vmem>>, vector<1x16x40xf32>
    %173 = vector.shape_cast %172 : vector<1x16x40xf32> to vector<16x40xf32>
    %174 = vector.shape_cast %171 : vector<16x40xf32> to vector<1x16x40xf32>
    tpu.vector_store %arg5[%c0_206, %c256, %c0_207], %174 {strides = array<i32>} : memref<3x288x40xf32, #tpu.memory_space<vmem>>, vector<1x16x40xf32>,
    %c1_208 = arith.constant 1 : index
    %c16_209 = arith.constant 16 : index
    %c0_210 = arith.constant 0 : index
    %c0_211 = arith.constant 0 : index
    %175 = vector.load %arg1[%c1_208, %c16_209, %c0_210, %c0_211] : memref<2x24x16x40xf32, #tpu.memory_space<vmem>>, vector<1x1x16x40xf32>
    %176 = vector.shape_cast %175 : vector<1x1x16x40xf32> to vector<16x40xf32>
    %c0_212 = arith.constant 0 : index
    %c272 = arith.constant 272 : index
    %c0_213 = arith.constant 0 : index
    %177 = vector.load %arg5[%c0_212, %c272, %c0_213] : memref<3x288x40xf32, #tpu.memory_space<vmem>>, vector<1x16x40xf32>
    %178 = vector.shape_cast %177 : vector<1x16x40xf32> to vector<16x40xf32>
    %179 = vector.shape_cast %176 : vector<16x40xf32> to vector<1x16x40xf32>
    tpu.vector_store %arg5[%c0_212, %c272, %c0_213], %179 {strides = array<i32>} : memref<3x288x40xf32, #tpu.memory_space<vmem>>, vector<1x16x40xf32>,
    %c1_214 = arith.constant 1 : index
    %c3_215 = arith.constant 3 : index
    %c0_216 = arith.constant 0 : index
    %c0_217 = arith.constant 0 : index
    %180 = vector.load %arg1[%c1_214, %c3_215, %c0_216, %c0_217] : memref<2x24x16x40xf32, #tpu.memory_space<vmem>>, vector<1x1x16x40xf32>
    %181 = vector.shape_cast %180 : vector<1x1x16x40xf32> to vector<16x40xf32>
    %c1_218 = arith.constant 1 : index
    %c144_219 = arith.constant 144 : index
    %c0_220 = arith.constant 0 : index
    %182 = vector.load %arg5[%c1_218, %c144_219, %c0_220] : memref<3x288x40xf32, #tpu.memory_space<vmem>>, vector<1x16x40xf32>
    %183 = vector.shape_cast %182 : vector<1x16x40xf32> to vector<16x40xf32>
    %184 = vector.shape_cast %181 : vector<16x40xf32> to vector<1x16x40xf32>
    tpu.vector_store %arg5[%c1_218, %c144_219, %c0_220], %184 {strides = array<i32>} : memref<3x288x40xf32, #tpu.memory_space<vmem>>, vector<1x16x40xf32>,
    %c1_221 = arith.constant 1 : index
    %c5_222 = arith.constant 5 : index
    %c0_223 = arith.constant 0 : index
    %c0_224 = arith.constant 0 : index
    %185 = vector.load %arg1[%c1_221, %c5_222, %c0_223, %c0_224] : memref<2x24x16x40xf32, #tpu.memory_space<vmem>>, vector<1x1x16x40xf32>
    %186 = vector.shape_cast %185 : vector<1x1x16x40xf32> to vector<16x40xf32>
    %c1_225 = arith.constant 1 : index
    %c160_226 = arith.constant 160 : index
    %c0_227 = arith.constant 0 : index
    %187 = vector.load %arg5[%c1_225, %c160_226, %c0_227] : memref<3x288x40xf32, #tpu.memory_space<vmem>>, vector<1x16x40xf32>
    %188 = vector.shape_cast %187 : vector<1x16x40xf32> to vector<16x40xf32>
    %189 = vector.shape_cast %186 : vector<16x40xf32> to vector<1x16x40xf32>
    tpu.vector_store %arg5[%c1_225, %c160_226, %c0_227], %189 {strides = array<i32>} : memref<3x288x40xf32, #tpu.memory_space<vmem>>, vector<1x16x40xf32>,
    %c1_228 = arith.constant 1 : index
    %c7_229 = arith.constant 7 : index
    %c0_230 = arith.constant 0 : index
    %c0_231 = arith.constant 0 : index
    %190 = vector.load %arg1[%c1_228, %c7_229, %c0_230, %c0_231] : memref<2x24x16x40xf32, #tpu.memory_space<vmem>>, vector<1x1x16x40xf32>
    %191 = vector.shape_cast %190 : vector<1x1x16x40xf32> to vector<16x40xf32>
    %c1_232 = arith.constant 1 : index
    %c176_233 = arith.constant 176 : index
    %c0_234 = arith.constant 0 : index
    %192 = vector.load %arg5[%c1_232, %c176_233, %c0_234] : memref<3x288x40xf32, #tpu.memory_space<vmem>>, vector<1x16x40xf32>
    %193 = vector.shape_cast %192 : vector<1x16x40xf32> to vector<16x40xf32>
    %194 = vector.shape_cast %191 : vector<16x40xf32> to vector<1x16x40xf32>
    tpu.vector_store %arg5[%c1_232, %c176_233, %c0_234], %194 {strides = array<i32>} : memref<3x288x40xf32, #tpu.memory_space<vmem>>, vector<1x16x40xf32>,
    %c1_235 = arith.constant 1 : index
    %c9_236 = arith.constant 9 : index
    %c0_237 = arith.constant 0 : index
    %c0_238 = arith.constant 0 : index
    %195 = vector.load %arg1[%c1_235, %c9_236, %c0_237, %c0_238] : memref<2x24x16x40xf32, #tpu.memory_space<vmem>>, vector<1x1x16x40xf32>
    %196 = vector.shape_cast %195 : vector<1x1x16x40xf32> to vector<16x40xf32>
    %c1_239 = arith.constant 1 : index
    %c192_240 = arith.constant 192 : index
    %c0_241 = arith.constant 0 : index
    %197 = vector.load %arg5[%c1_239, %c192_240, %c0_241] : memref<3x288x40xf32, #tpu.memory_space<vmem>>, vector<1x16x40xf32>
    %198 = vector.shape_cast %197 : vector<1x16x40xf32> to vector<16x40xf32>
    %199 = vector.shape_cast %196 : vector<16x40xf32> to vector<1x16x40xf32>
    tpu.vector_store %arg5[%c1_239, %c192_240, %c0_241], %199 {strides = array<i32>} : memref<3x288x40xf32, #tpu.memory_space<vmem>>, vector<1x16x40xf32>,
    %c1_242 = arith.constant 1 : index
    %c11_243 = arith.constant 11 : index
    %c0_244 = arith.constant 0 : index
    %c0_245 = arith.constant 0 : index
    %200 = vector.load %arg1[%c1_242, %c11_243, %c0_244, %c0_245] : memref<2x24x16x40xf32, #tpu.memory_space<vmem>>, vector<1x1x16x40xf32>
    %201 = vector.shape_cast %200 : vector<1x1x16x40xf32> to vector<16x40xf32>
    %c1_246 = arith.constant 1 : index
    %c208_247 = arith.constant 208 : index
    %c0_248 = arith.constant 0 : index
    %202 = vector.load %arg5[%c1_246, %c208_247, %c0_248] : memref<3x288x40xf32, #tpu.memory_space<vmem>>, vector<1x16x40xf32>
    %203 = vector.shape_cast %202 : vector<1x16x40xf32> to vector<16x40xf32>
    %204 = vector.shape_cast %201 : vector<16x40xf32> to vector<1x16x40xf32>
    tpu.vector_store %arg5[%c1_246, %c208_247, %c0_248], %204 {strides = array<i32>} : memref<3x288x40xf32, #tpu.memory_space<vmem>>, vector<1x16x40xf32>,
    %c1_249 = arith.constant 1 : index
    %c13_250 = arith.constant 13 : index
    %c0_251 = arith.constant 0 : index
    %c0_252 = arith.constant 0 : index
    %205 = vector.load %arg1[%c1_249, %c13_250, %c0_251, %c0_252] : memref<2x24x16x40xf32, #tpu.memory_space<vmem>>, vector<1x1x16x40xf32>
    %206 = vector.shape_cast %205 : vector<1x1x16x40xf32> to vector<16x40xf32>
    %c1_253 = arith.constant 1 : index
    %c224_254 = arith.constant 224 : index
    %c0_255 = arith.constant 0 : index
    %207 = vector.load %arg5[%c1_253, %c224_254, %c0_255] : memref<3x288x40xf32, #tpu.memory_space<vmem>>, vector<1x16x40xf32>
    %208 = vector.shape_cast %207 : vector<1x16x40xf32> to vector<16x40xf32>
    %209 = vector.shape_cast %206 : vector<16x40xf32> to vector<1x16x40xf32>
    tpu.vector_store %arg5[%c1_253, %c224_254, %c0_255], %209 {strides = array<i32>} : memref<3x288x40xf32, #tpu.memory_space<vmem>>, vector<1x16x40xf32>,
    %c1_256 = arith.constant 1 : index
    %c15_257 = arith.constant 15 : index
    %c0_258 = arith.constant 0 : index
    %c0_259 = arith.constant 0 : index
    %210 = vector.load %arg1[%c1_256, %c15_257, %c0_258, %c0_259] : memref<2x24x16x40xf32, #tpu.memory_space<vmem>>, vector<1x1x16x40xf32>
    %211 = vector.shape_cast %210 : vector<1x1x16x40xf32> to vector<16x40xf32>
    %c1_260 = arith.constant 1 : index
    %c240_261 = arith.constant 240 : index
    %c0_262 = arith.constant 0 : index
    %212 = vector.load %arg5[%c1_260, %c240_261, %c0_262] : memref<3x288x40xf32, #tpu.memory_space<vmem>>, vector<1x16x40xf32>
    %213 = vector.shape_cast %212 : vector<1x16x40xf32> to vector<16x40xf32>
    %214 = vector.shape_cast %211 : vector<16x40xf32> to vector<1x16x40xf32>
    tpu.vector_store %arg5[%c1_260, %c240_261, %c0_262], %214 {strides = array<i32>} : memref<3x288x40xf32, #tpu.memory_space<vmem>>, vector<1x16x40xf32>,
    %c1_263 = arith.constant 1 : index
    %c17_264 = arith.constant 17 : index
    %c0_265 = arith.constant 0 : index
    %c0_266 = arith.constant 0 : index
    %215 = vector.load %arg1[%c1_263, %c17_264, %c0_265, %c0_266] : memref<2x24x16x40xf32, #tpu.memory_space<vmem>>, vector<1x1x16x40xf32>
    %216 = vector.shape_cast %215 : vector<1x1x16x40xf32> to vector<16x40xf32>
    %c1_267 = arith.constant 1 : index
    %c256_268 = arith.constant 256 : index
    %c0_269 = arith.constant 0 : index
    %217 = vector.load %arg5[%c1_267, %c256_268, %c0_269] : memref<3x288x40xf32, #tpu.memory_space<vmem>>, vector<1x16x40xf32>
    %218 = vector.shape_cast %217 : vector<1x16x40xf32> to vector<16x40xf32>
    %219 = vector.shape_cast %216 : vector<16x40xf32> to vector<1x16x40xf32>
    tpu.vector_store %arg5[%c1_267, %c256_268, %c0_269], %219 {strides = array<i32>} : memref<3x288x40xf32, #tpu.memory_space<vmem>>, vector<1x16x40xf32>,
    %c1_270 = arith.constant 1 : index
    %c19_271 = arith.constant 19 : index
    %c0_272 = arith.constant 0 : index
    %c0_273 = arith.constant 0 : index
    %220 = vector.load %arg1[%c1_270, %c19_271, %c0_272, %c0_273] : memref<2x24x16x40xf32, #tpu.memory_space<vmem>>, vector<1x1x16x40xf32>
    %221 = vector.shape_cast %220 : vector<1x1x16x40xf32> to vector<16x40xf32>
    %c1_274 = arith.constant 1 : index
    %c272_275 = arith.constant 272 : index
    %c0_276 = arith.constant 0 : index
    %222 = vector.load %arg5[%c1_274, %c272_275, %c0_276] : memref<3x288x40xf32, #tpu.memory_space<vmem>>, vector<1x16x40xf32>
    %223 = vector.shape_cast %222 : vector<1x16x40xf32> to vector<16x40xf32>
    %224 = vector.shape_cast %221 : vector<16x40xf32> to vector<1x16x40xf32>
    tpu.vector_store %arg5[%c1_274, %c272_275, %c0_276], %224 {strides = array<i32>} : memref<3x288x40xf32, #tpu.memory_space<vmem>>, vector<1x16x40xf32>,
    %c1_277 = arith.constant 1 : index
    %c6_278 = arith.constant 6 : index
    %c0_279 = arith.constant 0 : index
    %c0_280 = arith.constant 0 : index
    %225 = vector.load %arg1[%c1_277, %c6_278, %c0_279, %c0_280] : memref<2x24x16x40xf32, #tpu.memory_space<vmem>>, vector<1x1x16x40xf32>
    %226 = vector.shape_cast %225 : vector<1x1x16x40xf32> to vector<16x40xf32>
    %c2_281 = arith.constant 2 : index
    %c144_282 = arith.constant 144 : index
    %c0_283 = arith.constant 0 : index
    %227 = vector.load %arg5[%c2_281, %c144_282, %c0_283] : memref<3x288x40xf32, #tpu.memory_space<vmem>>, vector<1x16x40xf32>
    %228 = vector.shape_cast %227 : vector<1x16x40xf32> to vector<16x40xf32>
    %229 = vector.shape_cast %226 : vector<16x40xf32> to vector<1x16x40xf32>
    tpu.vector_store %arg5[%c2_281, %c144_282, %c0_283], %229 {strides = array<i32>} : memref<3x288x40xf32, #tpu.memory_space<vmem>>, vector<1x16x40xf32>,
    %c1_284 = arith.constant 1 : index
    %c8_285 = arith.constant 8 : index
    %c0_286 = arith.constant 0 : index
    %c0_287 = arith.constant 0 : index
    %230 = vector.load %arg1[%c1_284, %c8_285, %c0_286, %c0_287] : memref<2x24x16x40xf32, #tpu.memory_space<vmem>>, vector<1x1x16x40xf32>
    %231 = vector.shape_cast %230 : vector<1x1x16x40xf32> to vector<16x40xf32>
    %c2_288 = arith.constant 2 : index
    %c160_289 = arith.constant 160 : index
    %c0_290 = arith.constant 0 : index
    %232 = vector.load %arg5[%c2_288, %c160_289, %c0_290] : memref<3x288x40xf32, #tpu.memory_space<vmem>>, vector<1x16x40xf32>
    %233 = vector.shape_cast %232 : vector<1x16x40xf32> to vector<16x40xf32>
    %234 = vector.shape_cast %231 : vector<16x40xf32> to vector<1x16x40xf32>
    tpu.vector_store %arg5[%c2_288, %c160_289, %c0_290], %234 {strides = array<i32>} : memref<3x288x40xf32, #tpu.memory_space<vmem>>, vector<1x16x40xf32>,
    %c1_291 = arith.constant 1 : index
    %c10_292 = arith.constant 10 : index
    %c0_293 = arith.constant 0 : index
    %c0_294 = arith.constant 0 : index
    %235 = vector.load %arg1[%c1_291, %c10_292, %c0_293, %c0_294] : memref<2x24x16x40xf32, #tpu.memory_space<vmem>>, vector<1x1x16x40xf32>
    %236 = vector.shape_cast %235 : vector<1x1x16x40xf32> to vector<16x40xf32>
    %c2_295 = arith.constant 2 : index
    %c176_296 = arith.constant 176 : index
    %c0_297 = arith.constant 0 : index
    %237 = vector.load %arg5[%c2_295, %c176_296, %c0_297] : memref<3x288x40xf32, #tpu.memory_space<vmem>>, vector<1x16x40xf32>
    %238 = vector.shape_cast %237 : vector<1x16x40xf32> to vector<16x40xf32>
    %239 = vector.shape_cast %236 : vector<16x40xf32> to vector<1x16x40xf32>
    tpu.vector_store %arg5[%c2_295, %c176_296, %c0_297], %239 {strides = array<i32>} : memref<3x288x40xf32, #tpu.memory_space<vmem>>, vector<1x16x40xf32>,
    %c1_298 = arith.constant 1 : index
    %c12_299 = arith.constant 12 : index
    %c0_300 = arith.constant 0 : index
    %c0_301 = arith.constant 0 : index
    %240 = vector.load %arg1[%c1_298, %c12_299, %c0_300, %c0_301] : memref<2x24x16x40xf32, #tpu.memory_space<vmem>>, vector<1x1x16x40xf32>
    %241 = vector.shape_cast %240 : vector<1x1x16x40xf32> to vector<16x40xf32>
    %c2_302 = arith.constant 2 : index
    %c192_303 = arith.constant 192 : index
    %c0_304 = arith.constant 0 : index
    %242 = vector.load %arg5[%c2_302, %c192_303, %c0_304] : memref<3x288x40xf32, #tpu.memory_space<vmem>>, vector<1x16x40xf32>
    %243 = vector.shape_cast %242 : vector<1x16x40xf32> to vector<16x40xf32>
    %244 = vector.shape_cast %241 : vector<16x40xf32> to vector<1x16x40xf32>
    tpu.vector_store %arg5[%c2_302, %c192_303, %c0_304], %244 {strides = array<i32>} : memref<3x288x40xf32, #tpu.memory_space<vmem>>, vector<1x16x40xf32>,
    %c1_305 = arith.constant 1 : index
    %c14_306 = arith.constant 14 : index
    %c0_307 = arith.constant 0 : index
    %c0_308 = arith.constant 0 : index
    %245 = vector.load %arg1[%c1_305, %c14_306, %c0_307, %c0_308] : memref<2x24x16x40xf32, #tpu.memory_space<vmem>>, vector<1x1x16x40xf32>
    %246 = vector.shape_cast %245 : vector<1x1x16x40xf32> to vector<16x40xf32>
    %c2_309 = arith.constant 2 : index
    %c208_310 = arith.constant 208 : index
    %c0_311 = arith.constant 0 : index
    %247 = vector.load %arg5[%c2_309, %c208_310, %c0_311] : memref<3x288x40xf32, #tpu.memory_space<vmem>>, vector<1x16x40xf32>
    %248 = vector.shape_cast %247 : vector<1x16x40xf32> to vector<16x40xf32>
    %249 = vector.shape_cast %246 : vector<16x40xf32> to vector<1x16x40xf32>
    tpu.vector_store %arg5[%c2_309, %c208_310, %c0_311], %249 {strides = array<i32>} : memref<3x288x40xf32, #tpu.memory_space<vmem>>, vector<1x16x40xf32>,
    %c1_312 = arith.constant 1 : index
    %c16_313 = arith.constant 16 : index
    %c0_314 = arith.constant 0 : index
    %c0_315 = arith.constant 0 : index
    %250 = vector.load %arg1[%c1_312, %c16_313, %c0_314, %c0_315] : memref<2x24x16x40xf32, #tpu.memory_space<vmem>>, vector<1x1x16x40xf32>
    %251 = vector.shape_cast %250 : vector<1x1x16x40xf32> to vector<16x40xf32>
    %c2_316 = arith.constant 2 : index
    %c224_317 = arith.constant 224 : index
    %c0_318 = arith.constant 0 : index
    %252 = vector.load %arg5[%c2_316, %c224_317, %c0_318] : memref<3x288x40xf32, #tpu.memory_space<vmem>>, vector<1x16x40xf32>
    %253 = vector.shape_cast %252 : vector<1x16x40xf32> to vector<16x40xf32>
    %254 = vector.shape_cast %251 : vector<16x40xf32> to vector<1x16x40xf32>
    tpu.vector_store %arg5[%c2_316, %c224_317, %c0_318], %254 {strides = array<i32>} : memref<3x288x40xf32, #tpu.memory_space<vmem>>, vector<1x16x40xf32>,
    %c1_319 = arith.constant 1 : index
    %c18_320 = arith.constant 18 : index
    %c0_321 = arith.constant 0 : index
    %c0_322 = arith.constant 0 : index
    %255 = vector.load %arg1[%c1_319, %c18_320, %c0_321, %c0_322] : memref<2x24x16x40xf32, #tpu.memory_space<vmem>>, vector<1x1x16x40xf32>
    %256 = vector.shape_cast %255 : vector<1x1x16x40xf32> to vector<16x40xf32>
    %c2_323 = arith.constant 2 : index
    %c240_324 = arith.constant 240 : index
    %c0_325 = arith.constant 0 : index
    %257 = vector.load %arg5[%c2_323, %c240_324, %c0_325] : memref<3x288x40xf32, #tpu.memory_space<vmem>>, vector<1x16x40xf32>
    %258 = vector.shape_cast %257 : vector<1x16x40xf32> to vector<16x40xf32>
    %259 = vector.shape_cast %256 : vector<16x40xf32> to vector<1x16x40xf32>
    tpu.vector_store %arg5[%c2_323, %c240_324, %c0_325], %259 {strides = array<i32>} : memref<3x288x40xf32, #tpu.memory_space<vmem>>, vector<1x16x40xf32>,
    %c1_326 = arith.constant 1 : index
    %c20_327 = arith.constant 20 : index
    %c0_328 = arith.constant 0 : index
    %c0_329 = arith.constant 0 : index
    %260 = vector.load %arg1[%c1_326, %c20_327, %c0_328, %c0_329] : memref<2x24x16x40xf32, #tpu.memory_space<vmem>>, vector<1x1x16x40xf32>
    %261 = vector.shape_cast %260 : vector<1x1x16x40xf32> to vector<16x40xf32>
    %c2_330 = arith.constant 2 : index
    %c256_331 = arith.constant 256 : index
    %c0_332 = arith.constant 0 : index
    %262 = vector.load %arg5[%c2_330, %c256_331, %c0_332] : memref<3x288x40xf32, #tpu.memory_space<vmem>>, vector<1x16x40xf32>
    %263 = vector.shape_cast %262 : vector<1x16x40xf32> to vector<16x40xf32>
    %264 = vector.shape_cast %261 : vector<16x40xf32> to vector<1x16x40xf32>
    tpu.vector_store %arg5[%c2_330, %c256_331, %c0_332], %264 {strides = array<i32>} : memref<3x288x40xf32, #tpu.memory_space<vmem>>, vector<1x16x40xf32>,
    %c1_333 = arith.constant 1 : index
    %c22_334 = arith.constant 22 : index
    %c0_335 = arith.constant 0 : index
    %c0_336 = arith.constant 0 : index
    %265 = vector.load %arg1[%c1_333, %c22_334, %c0_335, %c0_336] : memref<2x24x16x40xf32, #tpu.memory_space<vmem>>, vector<1x1x16x40xf32>
    %266 = vector.shape_cast %265 : vector<1x1x16x40xf32> to vector<16x40xf32>
    %c2_337 = arith.constant 2 : index
    %c272_338 = arith.constant 272 : index
    %c0_339 = arith.constant 0 : index
    %267 = vector.load %arg5[%c2_337, %c272_338, %c0_339] : memref<3x288x40xf32, #tpu.memory_space<vmem>>, vector<1x16x40xf32>
    %268 = vector.shape_cast %267 : vector<1x16x40xf32> to vector<16x40xf32>
    %269 = vector.shape_cast %266 : vector<16x40xf32> to vector<1x16x40xf32>
    tpu.vector_store %arg5[%c2_337, %c272_338, %c0_339], %269 {strides = array<i32>} : memref<3x288x40xf32, #tpu.memory_space<vmem>>, vector<1x16x40xf32>,
    %c0_340 = arith.constant 0 : index
    %c0_341 = arith.constant 0 : index
    %c0_342 = arith.constant 0 : index
    %270 = vector.load %arg5[%c0_340, %c0_341, %c0_342] : memref<3x288x40xf32, #tpu.memory_space<vmem>>, vector<1x144x40xf32>
    %271 = vector.shape_cast %270 : vector<1x144x40xf32> to vector<144x40xf32>
    %c0_343 = arith.constant 0 : index
    %c0_344 = arith.constant 0 : index
    %c0_345 = arith.constant 0 : index
    %272 = vector.load %arg2[%c0_343, %c0_344, %c0_345] : memref<3x40x128xf32, #tpu.memory_space<vmem>>, vector<1x40x128xf32>
    %273 = vector.shape_cast %272 : vector<1x40x128xf32> to vector<40x128xf32>
    %cst = arith.constant dense<0.000000e+00> : vector<144x128xf32>
    %274 = tpu.matmul %271, %273, %cst {dimension_numbers = #tpu.dot_dimension_numbers<[1], [0], [0], [1], [0, 0, 1, 1], [], []>} : vector<144x40xf32>, vector<40x128xf32>, vector<144x128xf32> -> vector<144x128xf32>
    %c1_346 = arith.constant 1 : index
    %c0_347 = arith.constant 0 : index
    %c0_348 = arith.constant 0 : index
    %275 = vector.load %arg5[%c1_346, %c0_347, %c0_348] : memref<3x288x40xf32, #tpu.memory_space<vmem>>, vector<1x144x40xf32>
    %276 = vector.shape_cast %275 : vector<1x144x40xf32> to vector<144x40xf32>
    %c1_349 = arith.constant 1 : index
    %c0_350 = arith.constant 0 : index
    %c0_351 = arith.constant 0 : index
    %277 = vector.load %arg2[%c1_349, %c0_350, %c0_351] : memref<3x40x128xf32, #tpu.memory_space<vmem>>, vector<1x40x128xf32>
    %278 = vector.shape_cast %277 : vector<1x40x128xf32> to vector<40x128xf32>
    %cst_352 = arith.constant dense<0.000000e+00> : vector<144x128xf32>
    %279 = tpu.matmul %276, %278, %cst_352 {dimension_numbers = #tpu.dot_dimension_numbers<[1], [0], [0], [1], [0, 0, 1, 1], [], []>} : vector<144x40xf32>, vector<40x128xf32>, vector<144x128xf32> -> vector<144x128xf32>
    %280 = arith.addf %274, %279 : vector<144x128xf32>
    %c2_353 = arith.constant 2 : index
    %c0_354 = arith.constant 0 : index
    %c0_355 = arith.constant 0 : index
    %281 = vector.load %arg5[%c2_353, %c0_354, %c0_355] : memref<3x288x40xf32, #tpu.memory_space<vmem>>, vector<1x144x40xf32>
    %282 = vector.shape_cast %281 : vector<1x144x40xf32> to vector<144x40xf32>
    %c2_356 = arith.constant 2 : index
    %c0_357 = arith.constant 0 : index
    %c0_358 = arith.constant 0 : index
    %283 = vector.load %arg2[%c2_356, %c0_357, %c0_358] : memref<3x40x128xf32, #tpu.memory_space<vmem>>, vector<1x40x128xf32>
    %284 = vector.shape_cast %283 : vector<1x40x128xf32> to vector<40x128xf32>
    %cst_359 = arith.constant dense<0.000000e+00> : vector<144x128xf32>
    %285 = tpu.matmul %282, %284, %cst_359 {dimension_numbers = #tpu.dot_dimension_numbers<[1], [0], [0], [1], [0, 0, 1, 1], [], []>} : vector<144x40xf32>, vector<40x128xf32>, vector<144x128xf32> -> vector<144x128xf32>
    %286 = arith.addf %280, %285 : vector<144x128xf32>
    %c0_360 = arith.constant 0 : index
    %c0_361 = arith.constant 0 : index
    %287 = vector.load %arg3[%c0_360, %c0_361] : memref<1x128xf32, #tpu.memory_space<vmem>>, vector<1x128xf32>
    %288 = vector.broadcast %287 : vector<1x128xf32> to vector<144x128xf32>
    %289 = arith.addf %286, %288 : vector<144x128xf32>
    %c0_362 = arith.constant 0 : index
    %c0_363 = arith.constant 0 : index
    %290 = vector.load %arg4[%c0_362, %c0_363] : memref<288x128xf32, #tpu.memory_space<vmem>>, vector<144x128xf32>
    tpu.vector_store %arg4[%c0_362, %c0_363], %289 {strides = array<i32>} : memref<288x128xf32, #tpu.memory_space<vmem>>, vector<144x128xf32>,
    %c0_364 = arith.constant 0 : index
    %c144_365 = arith.constant 144 : index
    %c0_366 = arith.constant 0 : index
    %291 = vector.load %arg5[%c0_364, %c144_365, %c0_366] : memref<3x288x40xf32, #tpu.memory_space<vmem>>, vector<1x144x40xf32>
    %292 = vector.shape_cast %291 : vector<1x144x40xf32> to vector<144x40xf32>
    %c0_367 = arith.constant 0 : index
    %c0_368 = arith.constant 0 : index
    %c0_369 = arith.constant 0 : index
    %293 = vector.load %arg2[%c0_367, %c0_368, %c0_369] : memref<3x40x128xf32, #tpu.memory_space<vmem>>, vector<1x40x128xf32>
    %294 = vector.shape_cast %293 : vector<1x40x128xf32> to vector<40x128xf32>
    %cst_370 = arith.constant dense<0.000000e+00> : vector<144x128xf32>
    %295 = tpu.matmul %292, %294, %cst_370 {dimension_numbers = #tpu.dot_dimension_numbers<[1], [0], [0], [1], [0, 0, 1, 1], [], []>} : vector<144x40xf32>, vector<40x128xf32>, vector<144x128xf32> -> vector<144x128xf32>
    %c1_371 = arith.constant 1 : index
    %c144_372 = arith.constant 144 : index
    %c0_373 = arith.constant 0 : index
    %296 = vector.load %arg5[%c1_371, %c144_372, %c0_373] : memref<3x288x40xf32, #tpu.memory_space<vmem>>, vector<1x144x40xf32>
    %297 = vector.shape_cast %296 : vector<1x144x40xf32> to vector<144x40xf32>
    %c1_374 = arith.constant 1 : index
    %c0_375 = arith.constant 0 : index
    %c0_376 = arith.constant 0 : index
    %298 = vector.load %arg2[%c1_374, %c0_375, %c0_376] : memref<3x40x128xf32, #tpu.memory_space<vmem>>, vector<1x40x128xf32>
    %299 = vector.shape_cast %298 : vector<1x40x128xf32> to vector<40x128xf32>
    %cst_377 = arith.constant dense<0.000000e+00> : vector<144x128xf32>
    %300 = tpu.matmul %297, %299, %cst_377 {dimension_numbers = #tpu.dot_dimension_numbers<[1], [0], [0], [1], [0, 0, 1, 1], [], []>} : vector<144x40xf32>, vector<40x128xf32>, vector<144x128xf32> -> vector<144x128xf32>
    %301 = arith.addf %295, %300 : vector<144x128xf32>
    %c2_378 = arith.constant 2 : index
    %c144_379 = arith.constant 144 : index
    %c0_380 = arith.constant 0 : index
    %302 = vector.load %arg5[%c2_378, %c144_379, %c0_380] : memref<3x288x40xf32, #tpu.memory_space<vmem>>, vector<1x144x40xf32>
    %303 = vector.shape_cast %302 : vector<1x144x40xf32> to vector<144x40xf32>
    %c2_381 = arith.constant 2 : index
    %c0_382 = arith.constant 0 : index
    %c0_383 = arith.constant 0 : index
    %304 = vector.load %arg2[%c2_381, %c0_382, %c0_383] : memref<3x40x128xf32, #tpu.memory_space<vmem>>, vector<1x40x128xf32>
    %305 = vector.shape_cast %304 : vector<1x40x128xf32> to vector<40x128xf32>
    %cst_384 = arith.constant dense<0.000000e+00> : vector<144x128xf32>
    %306 = tpu.matmul %303, %305, %cst_384 {dimension_numbers = #tpu.dot_dimension_numbers<[1], [0], [0], [1], [0, 0, 1, 1], [], []>} : vector<144x40xf32>, vector<40x128xf32>, vector<144x128xf32> -> vector<144x128xf32>
    %307 = arith.addf %301, %306 : vector<144x128xf32>
    %c0_385 = arith.constant 0 : index
    %c0_386 = arith.constant 0 : index
    %308 = vector.load %arg3[%c0_385, %c0_386] : memref<1x128xf32, #tpu.memory_space<vmem>>, vector<1x128xf32>
    %309 = vector.broadcast %308 : vector<1x128xf32> to vector<144x128xf32>
    %310 = arith.addf %307, %309 : vector<144x128xf32>
    %c144_387 = arith.constant 144 : index
    %c0_388 = arith.constant 0 : index
    %311 = vector.load %arg4[%c144_387, %c0_388] : memref<288x128xf32, #tpu.memory_space<vmem>>, vector<144x128xf32>
    tpu.vector_store %arg4[%c144_387, %c0_388], %310 {strides = array<i32>} : memref<288x128xf32, #tpu.memory_space<vmem>>, vector<144x128xf32>,
    return
  }
  func.func @transform_0(%arg0: i32) -> (i32, i32, i32, i32) {
    %c0_i32 = arith.constant 0 : i32
    %c0_i32_0 = arith.constant 0 : i32
    %c0_i32_1 = arith.constant 0 : i32
    %c0_i32_2 = arith.constant 0 : i32
    %c0_i32_3 = arith.constant 0 : i32
    return %c0_i32, %c0_i32_0, %c0_i32_1, %c0_i32_2 : i32, i32, i32, i32
  }
  func.func @transform_1(%arg0: i32) -> (i32, i32, i32) {
    %c0_i32 = arith.constant 0 : i32
    %c0_i32_0 = arith.constant 0 : i32
    %c0_i32_1 = arith.constant 0 : i32
    %c0_i32_2 = arith.constant 0 : i32
    return %c0_i32, %c0_i32_0, %c0_i32_1 : i32, i32, i32
  }
  func.func @transform_2(%arg0: i32) -> (i32, i32) {
    %c0_i32 = arith.constant 0 : i32
    %c0_i32_0 = arith.constant 0 : i32
    %c0_i32_1 = arith.constant 0 : i32
    return %c0_i32, %c0_i32_0 : i32, i32
  }
  func.func @transform_3(%arg0: i32) -> (i32, i32) {
    %c0_i32 = arith.constant 0 : i32
    %c0_i32_0 = arith.constant 0 : i32
    %c0_i32_1 = arith.constant 0 : i32
    return %c0_i32, %c0_i32_0 : i32, i32
  }
}

</mosaic_0001>

<bundles_post_ra>
// kernel: conv2d_pallas.1
= control target key start
LH: loop header
LB: loop body
LE: loop exit
PB: predicated region body
PF: predicated region fallthrough
CT: control target
= control target key end

     0   :  { %vm16_vm0 = vcmask 326656   ;;  %s3198_s1 = inlined_call_operand.vmem [shape: f32[3,40,128], index: 1, kind: input, shape index: {}]   ;;  %s3199_s0 = inlined_call_operand.vmem [shape: f32[2,24,16,40], index: 0, kind: input, shape index: {}]   ;;  %s3200_s2 = inlined_call_operand.vmem [shape: f32[1,128], index: 2, kind: input, shape index: {}]   ;;  %s3201_s3 = inlined_call_operand.vmem [shape: f32[288,128], index: 3, kind: output, shape index: {}]  }
   0x1   :  { %v1900_v0 = vld [vmem:[%s3198_s1 + $0x28] sm:$0xff]  ;;  %v1901_v1 = vld [vmem:[%s3198_s1 + $0x30] sm:$0xff]  ;;  %v1902_v2 = vld [vmem:[%s3198_s1 + $0x38] sm:$0xff] }
   0x2   :  { %v2390_v3 = vpack.c.bf16 %v1901_v1, %v1900_v0  ;;  %v1903_v4 = vld [vmem:[%s3198_s1 + $0x40] sm:$0xff]  ;;  %v1810_v5 = vld [vmem:[%s3199_s0 + $0x30] sm:$0xff]  ;;  %v1811_v8 = vld [vmem:[%s3199_s0 + $0x38] sm:$0xff] }
   0x3   :  { %v2394_v6 = vpack.c.bf16 %v1903_v4, %v1902_v2  ;;  %63 = vst.msk [vmem:[#allocation2 + $0x120] sm:$0xff] %vm16_vm0, %v1810_v5  ;;  %v1864_v7 = vld [vmem:[%s3199_s0 + $0x1b0] sm:$0xff]  ;;  %64 = vst.msk [vmem:[#allocation2 + $0x128] sm:$0xff] %vm16_vm0, %v1811_v8  ;;  %v1865_v9 = vld [vmem:[%s3199_s0 + $0x1b8] sm:$0xff] }
   0x4   :  { %2391 = vmatprep.subr.bf16.mxu0 %v2390_v3  ;;  %2415 = vmatprep.subr.bf16.mxu1 %v2390_v3  ;;  %193 = vst.msk [vmem:[#allocation2 + $0x1b0] sm:$0xff] %vm16_vm0, %v1864_v7  ;;  %v1812_v10 = vld [vmem:[%s3199_s0 + $0x50] sm:$0xff]  ;;  %v1904_v11 = vld [vmem:[%s3198_s1 + $0x48] sm:$0xff]  ;;  %v292_v12 = vld [vmem:[%s3198_s1] sm:$0xff] }
   0x5   :  { %2393 = vmatpush3.bf16.msra.mxu0 %v2390_v3  ;;  %2417 = vmatpush3.bf16.msra.mxu1 %v2390_v3  ;;  %v293_v13 = vld [vmem:[%s3198_s1 + $0x8] sm:$0xff]  ;;  %194 = vst.msk [vmem:[#allocation2 + $0x1b8] sm:$0xff] %vm16_vm0, %v1865_v9  ;;  %68 = vst.msk [vmem:[#allocation2 + $0x130] sm:$0xff] %vm16_vm0, %v1812_v10  ;;  %v1866_v14 = vld [vmem:[%s3199_s0 + $0x1d0] sm:$0xff] }
   0x6   :  { %v1813_v15 = vld [vmem:[%s3199_s0 + $0x58] sm:$0xff]  ;;  %2395 = vmatprep.subr.bf16.mxu0 %v2394_v6  ;;  %2419 = vmatprep.subr.bf16.mxu1 %v2394_v6  ;;  %198 = vst.msk [vmem:[#allocation2 + $0x1c0] sm:$0xff] %vm16_vm0, %v1866_v14  ;;  %v1814_v17 = vld [vmem:[%s3199_s0 + $0x70] sm:$0xff]  ;;  %v2398_v30 = vpack.c.bf16 %v293_v13, %v292_v12  ;;  %v296_v54 = vld [vmem:[%s3198_s1 + $0x20] sm:$0xff] }
   0x7   :  { %v1867_v16 = vld [vmem:[%s3199_s0 + $0x1d8] sm:$0xff]  ;;  %69 = vst.msk [vmem:[#allocation2 + $0x138] sm:$0xff] %vm16_vm0, %v1813_v15  ;;  %v1868_v18 = vld [vmem:[%s3199_s0 + $0x1f0] sm:$0xff]  ;;  %73 = vst.msk [vmem:[#allocation2 + $0x140] sm:$0xff] %vm16_vm0, %v1814_v17 }
   0x8   :  { %199 = vst.msk [vmem:[#allocation2 + $0x1c8] sm:$0xff] %vm16_vm0, %v1867_v16  ;;  %v1815_v19 = vld [vmem:[%s3199_s0 + $0x78] sm:$0xff]  ;;  %203 = vst.msk [vmem:[#allocation2 + $0x1d0] sm:$0xff] %vm16_vm0, %v1868_v18  ;;  %v1816_v21 = vld [vmem:[%s3199_s0 + $0x90] sm:$0xff] }
   0x9   :  { %74 = vst.msk [vmem:[#allocation2 + $0x148] sm:$0xff] %vm16_vm0, %v1815_v19  ;;  %v1869_v20 = vld [vmem:[%s3199_s0 + $0x1f8] sm:$0xff]  ;;  %v1870_v22 = vld [vmem:[%s3199_s0 + $0x210] sm:$0xff]  ;;  %78 = vst.msk [vmem:[#allocation2 + $0x150] sm:$0xff] %vm16_vm0, %v1816_v21  ;;  %2397 = vmatpush3.bf16.msra.mxu0 %v2394_v6  ;;  %2421 = vmatpush3.bf16.msra.mxu1 %v2394_v6 }
   0xa   :  { %204 = vst.msk [vmem:[#allocation2 + $0x1d8] sm:$0xff] %vm16_vm0, %v1869_v20  ;;  %208 = vst.msk [vmem:[#allocation2 + $0x1e0] sm:$0xff] %vm16_vm0, %v1870_v22  ;;  %v1817_v23 = vld [vmem:[%s3199_s0 + $0x98] sm:$0xff]  ;;  %v294_v24 = vld [vmem:[%s3198_s1 + $0x10] sm:$0xff]  ;;  %2176 = vmatprep.subr.mxu0 %v1904_v11  ;;  %2287 = vmatprep.subr.mxu1 %v1904_v11 }
   0xb   :  { %79 = vst.msk [vmem:[#allocation2 + $0x158] sm:$0xff] %vm16_vm0, %v1817_v23  ;;  %v295_v25 = vld [vmem:[%s3198_s1 + $0x18] sm:$0xff]  ;;  %v1818_v27 = vld [vmem:[%s3199_s0 + $0xb0] sm:$0xff]  ;;  %v297_v29 = vld [vmem:[#allocation2 + $0x120] sm:$0xff] }
   0xc   :  { %v1871_v26 = vld [vmem:[%s3199_s0 + $0x218] sm:$0xff]  ;;  %v1872_v28 = vld [vmem:[%s3199_s0 + $0x230] sm:$0xff]  ;;  %83 = vst.msk [vmem:[#allocation2 + $0x160] sm:$0xff] %vm16_vm0, %v1818_v27  ;;  %2178 = vmatprep.mubr.msk.f32.mxu0 %vm16_vm0, %v297_v29  ;;  %v298_v34 = vld [vmem:[#allocation2 + $0x128] sm:$0xff]  ;;  %v2402_v40 = vpack.c.bf16 %v295_v25, %v294_v24 }
   0xd   :  { %209 = vst.msk [vmem:[#allocation2 + $0x1e8] sm:$0xff] %vm16_vm0, %v1871_v26  ;;  %213 = vst.msk [vmem:[#allocation2 + $0x1f0] sm:$0xff] %vm16_vm0, %v1872_v28  ;;  %v1819_v31 = vld [vmem:[%s3199_s0 + $0xb8] sm:$0xff]  ;;  %v1056_v33 = vld [vmem:[#allocation2 + $0x1b0] sm:$0xff]  ;;  %2177 = vmatpush3.msra.mxu0 %v1904_v11  ;;  %2288 = vmatpush3.msra.mxu1 %v1904_v11 }
   0xe   :  { %v1873_v32 = vld [vmem:[%s3199_s0 + $0x238] sm:$0xff]  ;;  %84 = vst.msk [vmem:[#allocation2 + $0x168] sm:$0xff] %vm16_vm0, %v1819_v31  ;;  %v1820_v35 = vld [vmem:[%s3199_s0 + $0xd0] sm:$0xff]  ;;  %2289 = vmatprep.mubr.msk.f32.mxu1 %vm16_vm0, %v1056_v33  ;;  %2179 = vmatmul.mubr.msk.f32.vlgmr.msra.gmra.mrb[0].mxu0 %vm16_vm0, %v298_v34  ;;  %v1058_v39 = vld [vmem:[#allocation2 + $0x1c0] sm:$0xff] }
   0xf   :  { %214 = vst.msk [vmem:[#allocation2 + $0x1f8] sm:$0xff] %vm16_vm0, %v1873_v32  ;;  %v1057_v36 = vld [vmem:[#allocation2 + $0x1b8] sm:$0xff]  ;;  %88 = vst.msk [vmem:[#allocation2 + $0x170] sm:$0xff] %vm16_vm0, %v1820_v35  ;;  %v1874_v37 = vld [vmem:[%s3199_s0 + $0x250] sm:$0xff]  ;;  %2399 = vmatprep.subr.bf16.mxu0 %v2398_v30  ;;  %2423 = vmatprep.subr.bf16.mxu1 %v2398_v30 }
  0x10   :  { %218 = vst.msk [vmem:[#allocation2 + $0x200] sm:$0xff] %vm16_vm0, %v1874_v37  ;;  %v299_v38 = vld [vmem:[#allocation2 + $0x130] sm:$0xff]  ;;  %2290 = vmatmul.mubr.msk.f32.vlgmr.msra.gmra.mrb[0].mxu1 %vm16_vm0, %v1057_v36  ;;  %v300_v41 = vld [vmem:[#allocation2 + $0x138] sm:$0xff]  ;;  %v1059_v42 = vld [vmem:[#allocation2 + $0x1c8] sm:$0xff]  ;;  %2401 = vmatpush3.bf16.msra.mxu0 %v2398_v30 }
  0x11   :  { %2425 = vmatpush3.bf16.msra.mxu1 %v2398_v30  ;;  %v301_v43 = vld [vmem:[#allocation2 + $0x140] sm:$0xff]  ;;  %v1821_v44 = vld [vmem:[%s3199_s0 + $0xd8] sm:$0xff]  ;;  %2181 = vmatprep.mubr.msk.f32.mxu0 %vm16_vm0, %v299_v38  ;;  %v1060_v46 = vld [vmem:[#allocation2 + $0x1d0] sm:$0xff] }
  0x12   :  { %v1875_v45 = vld [vmem:[%s3199_s0 + $0x258] sm:$0xff]  ;;  %2292 = vmatprep.mubr.msk.f32.mxu1 %vm16_vm0, %v1058_v39  ;;  %89 = vst.msk [vmem:[#allocation2 + $0x178] sm:$0xff] %vm16_vm0, %v1821_v44  ;;  %2182 = vmatmul.mubr.msk.f32.gmra.mrb[2].mxu0 %vm16_vm0, %v300_v41  ;;  %v302_v47 = vld [vmem:[#allocation2 + $0x148] sm:$0xff]  ;;  %v1822_v49 = vld [vmem:[%s3199_s0 + $0xf0] sm:$0xff] }
  0x13   :  { %219 = vst.msk [vmem:[#allocation2 + $0x208] sm:$0xff] %vm16_vm0, %v1875_v45  ;;  %v1061_v48 = vld [vmem:[#allocation2 + $0x1d8] sm:$0xff]  ;;  %2403 = vmatprep.subr.bf16.mxu0 %v2402_v40  ;;  %2184 = vmatprep.mubr.msk.f32.mxu0 %vm16_vm0, %v301_v43  ;;  %v303_v50 = vld [vmem:[#allocation2 + $0x150] sm:$0xff]  ;;  %93 = vst.msk [vmem:[#allocation2 + $0x180] sm:$0xff] %vm16_vm0, %v1822_v49 }
  0x14   :  { %2293 = vmatmul.mubr.msk.f32.gmra.mrb[2].mxu1 %vm16_vm0, %v1059_v42  ;;  %v1876_v51 = vld [vmem:[%s3199_s0 + $0x270] sm:$0xff]  ;;  %v1823_v52 = vld [vmem:[%s3199_s0 + $0xf8] sm:$0xff]  ;;  %v1062_v53 = vld [vmem:[#allocation2 + $0x1e0] sm:$0xff]  ;;  %2427 = vmatprep.subr.bf16.mxu1 %v2402_v40 }
  0x15   :  { %2295 = vmatprep.mubr.msk.f32.mxu1 %vm16_vm0, %v1060_v46  ;;  %223 = vst.msk [vmem:[#allocation2 + $0x210] sm:$0xff] %vm16_vm0, %v1876_v51  ;;  %94 = vst.msk [vmem:[#allocation2 + $0x188] sm:$0xff] %vm16_vm0, %v1823_v52  ;;  %v1877_v55 = vld [vmem:[%s3199_s0 + $0x278] sm:$0xff]  ;;  %2405 = vmatpush3.bf16.msra.mxu0 %v2402_v40  ;;  %v1824_v57 = vld [vmem:[%s3199_s0 + $0x110] sm:$0xff] }
  0x16   :  { %v304_v56 = vld [vmem:[#allocation2 + $0x158] sm:$0xff]  ;;  %2429 = vmatpush3.bf16.msra.mxu1 %v2402_v40  ;;  %224 = vst.msk [vmem:[#allocation2 + $0x218] sm:$0xff] %vm16_vm0, %v1877_v55  ;;  %v1878_v58 = vld [vmem:[%s3199_s0 + $0x290] sm:$0xff]  ;;  %2185 = vmatmul.mubr.msk.f32.gmra.mrb[4].mxu0 %vm16_vm0, %v302_v47  ;;  %v1063_v60 = vld [vmem:[#allocation2 + $0x1e8] sm:$0xff] }
  0x17   :  { %v1825_v59 = vld [vmem:[%s3199_s0 + $0x118] sm:$0xff]  ;;  %2213 = vmatprep.subr.mxu0 %v296_v54  ;;  %98 = vst.msk [vmem:[#allocation2 + $0x190] sm:$0xff] %vm16_vm0, %v1824_v57  ;;  %228 = vst.msk [vmem:[#allocation2 + $0x220] sm:$0xff] %vm16_vm0, %v1878_v58  ;;  %v1826_v62 = vld [vmem:[%s3199_s0 + $0x130] sm:$0xff]  ;;  %2187 = vmatprep.mubr.msk.f32.mxu0 %vm16_vm0, %v303_v50 }
  0x18   :  { %99 = vst.msk [vmem:[#allocation2 + $0x198] sm:$0xff] %vm16_vm0, %v1825_v59  ;;  %v1879_v61 = vld [vmem:[%s3199_s0 + $0x298] sm:$0xff]  ;;  %v1880_v63 = vld [vmem:[%s3199_s0 + $0x2b0] sm:$0xff]  ;;  %2296 = vmatmul.mubr.msk.f32.gmra.mrb[4].mxu1 %vm16_vm0, %v1061_v48  ;;  %103 = vst.msk [vmem:[#allocation2 + $0x1a0] sm:$0xff] %vm16_vm0, %v1826_v62  ;;  %2324 = vmatprep.subr.mxu1 %v296_v54 }
  0x19   :  { %229 = vst.msk [vmem:[#allocation2 + $0x228] sm:$0xff] %vm16_vm0, %v1879_v61  ;;  %233 = vst.msk [vmem:[#allocation2 + $0x230] sm:$0xff] %vm16_vm0, %v1880_v63  ;;  %v1827_v0 = vld [vmem:[%s3199_s0 + $0x138] sm:$0xff]  ;;  %v14_v2 = vld [vmem:[%s3199_s0] sm:$0xff]  ;;  %2298 = vmatprep.mubr.msk.f32.mxu1 %vm16_vm0, %v1062_v53  ;;  %2214 = vmatpush3.msra.mxu0 %v296_v54 }
  0x1a   :  { %v1881_v1 = vld [vmem:[%s3199_s0 + $0x2b8] sm:$0xff]  ;;  %v305_v3 = vld [vmem:[#allocation2 + $0x160] sm:$0xff]  ;;  %v1064_v4 = vld [vmem:[#allocation2 + $0x1f0] sm:$0xff]  ;;  %104 = vst.msk [vmem:[#allocation2 + $0x1a8] sm:$0xff] %vm16_vm0, %v1827_v0  ;;  %2325 = vmatpush3.msra.mxu1 %v296_v54  ;;  %2188 = vmatmul.mubr.msk.f32.gmra.mrb[6].mxu0 %vm16_vm0, %v304_v56 }
  0x1b   :  { %234 = vst.msk [vmem:[#allocation2 + $0x238] sm:$0xff] %vm16_vm0, %v1881_v1  ;;  %17 = vst.msk [vmem:[#allocation2] sm:$0xff] %vm16_vm0, %v14_v2  ;;  %v1846_v5 = vld [vmem:[%s3199_s0 + $0x180] sm:$0xff]  ;;  %v15_v6 = vld [vmem:[%s3199_s0 + $0x8] sm:$0xff]  ;;  %2190 = vmatprep.mubr.msk.f32.mxu0 %vm16_vm0, %v305_v3 }
  0x1c   :  { %148 = vst.msk [vmem:[#allocation2 + $0x90] sm:$0xff] %vm16_vm0, %v1846_v5  ;;  %v1941_v7 = vld [vmem:[%s3198_s1 + $0x50] sm:$0xff]  ;;  %v1942_v8 = vld [vmem:[%s3198_s1 + $0x58] sm:$0xff]  ;;  %18 = vst.msk [vmem:[#allocation2 + $0x8] sm:$0xff] %vm16_vm0, %v15_v6  ;;  %2299 = vmatmul.mubr.msk.f32.gmra.mrb[6].mxu1 %vm16_vm0, %v1063_v60 }
  0x1d   :  { %v2737_v9 = vpack.c.bf16 %v1942_v8, %v1941_v7  ;;  %v1847_v10 = vld [vmem:[%s3199_s0 + $0x188] sm:$0xff]  ;;  %v1794_v11 = vld [vmem:[%s3199_s0 + $0x20] sm:$0xff]  ;;  %v1065_v13 = vld [vmem:[#allocation2 + $0x1f8] sm:$0xff]  ;;  %2301 = vmatprep.mubr.msk.f32.mxu1 %vm16_vm0, %v1064_v4 }
  0x1e   :  { %v306_v12 = vld [vmem:[#allocation2 + $0x168] sm:$0xff]  ;;  %149 = vst.msk [vmem:[#allocation2 + $0x98] sm:$0xff] %vm16_vm0, %v1847_v10  ;;  %22 = vst.msk [vmem:[#allocation2 + $0x10] sm:$0xff] %vm16_vm0, %v1794_v11  ;;  %v1848_v14 = vld [vmem:[%s3199_s0 + $0x1a0] sm:$0xff] }
  0x1f   :  { %v307_v15 = vld [vmem:[#allocation2 + $0x170] sm:$0xff]  ;;  %2407 = vmatprep.subr.bf16.mxu0 %v2737_v9  ;;  %153 = vst.msk [vmem:[#allocation2 + $0xa0] sm:$0xff] %vm16_vm0, %v1848_v14  ;;  %v1795_v16 = vld [vmem:[%s3199_s0 + $0x28] sm:$0xff]  ;;  %v1066_v18 = vld [vmem:[#allocation2 + $0x200] sm:$0xff]  ;;  %2431 = vmatprep.subr.bf16.mxu1 %v2737_v9 }
  0x20   :  { %v1849_v17 = vld [vmem:[%s3199_s0 + $0x1a8] sm:$0xff]  ;;  %23 = vst.msk [vmem:[#allocation2 + $0x18] sm:$0xff] %vm16_vm0, %v1795_v16  ;;  %2191 = vmatmul.mubr.msk.f32.gmra.mrb[8].mxu0 %vm16_vm0, %v306_v12  ;;  %2302 = vmatmul.mubr.msk.f32.gmra.mrb[8].mxu1 %vm16_vm0, %v1065_v13  ;;  %v308_v19 = vld [vmem:[#allocation2 + $0x178] sm:$0xff]  ;;  %v309_v21 = vld [vmem:[#allocation2 + $0x180] sm:$0xff] }
  0x21   :  { %154 = vst.msk [vmem:[#allocation2 + $0xa8] sm:$0xff] %vm16_vm0, %v1849_v17  ;;  %2193 = vmatprep.mubr.msk.f32.mxu0 %vm16_vm0, %v307_v15  ;;  %v1067_v20 = vld [vmem:[#allocation2 + $0x208] sm:$0xff]  ;;  %2304 = vmatprep.mubr.msk.f32.mxu1 %vm16_vm0, %v1066_v18  ;;  %v1796_v22 = vld [vmem:[%s3199_s0 + $0x40] sm:$0xff]  ;;  %v1068_v24 = vld [vmem:[#allocation2 + $0x210] sm:$0xff] }
  0x22   :  { %v1850_v23 = vld [vmem:[%s3199_s0 + $0x1c0] sm:$0xff]  ;;  %27 = vst.msk [vmem:[#allocation2 + $0x20] sm:$0xff] %vm16_vm0, %v1796_v22  ;;  %v1797_v25 = vld [vmem:[%s3199_s0 + $0x48] sm:$0xff]  ;;  %v1069_v31 = vld [vmem:[#allocation2 + $0x218] sm:$0xff] }
  0x23   :  { %158 = vst.msk [vmem:[#allocation2 + $0xb0] sm:$0xff] %vm16_vm0, %v1850_v23  ;;  %v1851_v26 = vld [vmem:[%s3199_s0 + $0x1c8] sm:$0xff]  ;;  %28 = vst.msk [vmem:[#allocation2 + $0x28] sm:$0xff] %vm16_vm0, %v1797_v25  ;;  %v1798_v27 = vld [vmem:[%s3199_s0 + $0x60] sm:$0xff] }
  0x24   :  { %2194 = vmatmul.mubr.msk.f32.gmra.mrb[10].mxu0 %vm16_vm0, %v308_v19  ;;  %159 = vst.msk [vmem:[#allocation2 + $0xb8] sm:$0xff] %vm16_vm0, %v1851_v26  ;;  %2305 = vmatmul.mubr.msk.f32.gmra.mrb[10].mxu1 %vm16_vm0, %v1067_v20  ;;  %v310_v28 = vld [vmem:[#allocation2 + $0x188] sm:$0xff]  ;;  %32 = vst.msk [vmem:[#allocation2 + $0x30] sm:$0xff] %vm16_vm0, %v1798_v27  ;;  %v1852_v29 = vld [vmem:[%s3199_s0 + $0x1e0] sm:$0xff] }
  0x25   :  { %2196 = vmatprep.mubr.msk.f32.mxu0 %vm16_vm0, %v309_v21  ;;  %v1799_v30 = vld [vmem:[%s3199_s0 + $0x68] sm:$0xff]  ;;  %108 = vst.msk [vmem:[#allocation2 + $0x240] sm:$0xff] %vm16_vm0, %v1798_v27  ;;  %2307 = vmatprep.mubr.msk.f32.mxu1 %vm16_vm0, %v1068_v24  ;;  %v311_v32 = vld [vmem:[#allocation2 + $0x190] sm:$0xff]  ;;  %v1070_v33 = vld [vmem:[#allocation2 + $0x220] sm:$0xff] }
  0x26   :  { %163 = vst.msk [vmem:[#allocation2 + $0xc0] sm:$0xff] %vm16_vm0, %v1852_v29  ;;  %33 = vst.msk [vmem:[#allocation2 + $0x38] sm:$0xff] %vm16_vm0, %v1799_v30  ;;  %v312_v34 = vld [vmem:[#allocation2 + $0x198] sm:$0xff]  ;;  %v1853_v35 = vld [vmem:[%s3199_s0 + $0x1e8] sm:$0xff] }
  0x27   :  { %237 = vst.msk [vmem:[#allocation2 + $0x2d0] sm:$0xff] %vm16_vm0, %v1852_v29  ;;  %109 = vst.msk [vmem:[#allocation2 + $0x248] sm:$0xff] %vm16_vm0, %v1799_v30  ;;  %v1800_v36 = vld [vmem:[%s3199_s0 + $0x80] sm:$0xff]  ;;  %v1801_v38 = vld [vmem:[%s3199_s0 + $0x88] sm:$0xff] }
  0x28   :  { %2197 = vmatmul.mubr.msk.f32.gmra.mrb[12].mxu0 %vm16_vm0, %v310_v28  ;;  %164 = vst.msk [vmem:[#allocation2 + $0xc8] sm:$0xff] %vm16_vm0, %v1853_v35  ;;  %37 = vst.msk [vmem:[#allocation2 + $0x40] sm:$0xff] %vm16_vm0, %v1800_v36  ;;  %v1854_v37 = vld [vmem:[%s3199_s0 + $0x200] sm:$0xff]  ;;  %v1855_v39 = vld [vmem:[%s3199_s0 + $0x208] sm:$0xff]  ;;  %2308 = vmatmul.mubr.msk.f32.gmra.mrb[12].mxu1 %vm16_vm0, %v1069_v31 }
  0x29   :  { %238 = vst.msk [vmem:[#allocation2 + $0x2d8] sm:$0xff] %vm16_vm0, %v1853_v35  ;;  %112 = vst.msk [vmem:[#allocation2 + $0x250] sm:$0xff] %vm16_vm0, %v1800_v36  ;;  %2199 = vmatprep.mubr.msk.f32.mxu0 %vm16_vm0, %v311_v32  ;;  %v1802_v40 = vld [vmem:[%s3199_s0 + $0xa0] sm:$0xff]  ;;  %v1803_v42 = vld [vmem:[%s3199_s0 + $0xa8] sm:$0xff]  ;;  %2310 = vmatprep.mubr.msk.f32.mxu1 %vm16_vm0, %v1070_v33 }
  0x2a   :  { %168 = vst.msk [vmem:[#allocation2 + $0xd0] sm:$0xff] %vm16_vm0, %v1854_v37  ;;  %38 = vst.msk [vmem:[#allocation2 + $0x48] sm:$0xff] %vm16_vm0, %v1801_v38  ;;  %v1856_v41 = vld [vmem:[%s3199_s0 + $0x220] sm:$0xff]  ;;  %v1071_v43 = vld [vmem:[#allocation2 + $0x228] sm:$0xff] }
  0x2b   :  { %169 = vst.msk [vmem:[#allocation2 + $0xd8] sm:$0xff] %vm16_vm0, %v1855_v39  ;;  %241 = vst.msk [vmem:[#allocation2 + $0x2e0] sm:$0xff] %vm16_vm0, %v1854_v37  ;;  %v313_v44 = vld [vmem:[#allocation2 + $0x1a0] sm:$0xff]  ;;  %v1857_v45 = vld [vmem:[%s3199_s0 + $0x228] sm:$0xff] }
  0x2c   :  { %113 = vst.msk [vmem:[#allocation2 + $0x258] sm:$0xff] %vm16_vm0, %v1801_v38  ;;  %242 = vst.msk [vmem:[#allocation2 + $0x2e8] sm:$0xff] %vm16_vm0, %v1855_v39  ;;  %v1072_v46 = vld [vmem:[#allocation2 + $0x230] sm:$0xff]  ;;  %v1804_v47 = vld [vmem:[%s3199_s0 + $0xc0] sm:$0xff]  ;;  %2200 = vmatmul.mubr.msk.f32.gmra.mrb[14].mxu0 %vm16_vm0, %v312_v34  ;;  %2311 = vmatmul.mubr.msk.f32.gmra.mrb[14].mxu1 %vm16_vm0, %v1071_v43 }
  0x2d   :  { %42 = vst.msk [vmem:[#allocation2 + $0x50] sm:$0xff] %vm16_vm0, %v1802_v40  ;;  %173 = vst.msk [vmem:[#allocation2 + $0xe0] sm:$0xff] %vm16_vm0, %v1856_v41  ;;  %v1858_v48 = vld [vmem:[%s3199_s0 + $0x240] sm:$0xff]  ;;  %v1805_v49 = vld [vmem:[%s3199_s0 + $0xc8] sm:$0xff]  ;;  %2202 = vmatprep.mubr.msk.f32.mxu0 %vm16_vm0, %v313_v44  ;;  %2313 = vmatprep.mubr.msk.f32.mxu1 %vm16_vm0, %v1072_v46 }
  0x2e   :  { %43 = vst.msk [vmem:[#allocation2 + $0x58] sm:$0xff] %vm16_vm0, %v1803_v42  ;;  %116 = vst.msk [vmem:[#allocation2 + $0x260] sm:$0xff] %vm16_vm0, %v1802_v40  ;;  %v314_v50 = vld [vmem:[#allocation2 + $0x1a8] sm:$0xff]  ;;  %v1073_v51 = vld [vmem:[#allocation2 + $0x238] sm:$0xff] }
  0x2f   :  { %245 = vst.msk [vmem:[#allocation2 + $0x2f0] sm:$0xff] %vm16_vm0, %v1856_v41  ;;  %117 = vst.msk [vmem:[#allocation2 + $0x268] sm:$0xff] %vm16_vm0, %v1803_v42  ;;  %v274_v52 = vld [vmem:[#allocation2] sm:$0xff]  ;;  %v1859_v53 = vld [vmem:[%s3199_s0 + $0x248] sm:$0xff] }
  0x30   :  { %174 = vst.msk [vmem:[#allocation2 + $0xe8] sm:$0xff] %vm16_vm0, %v1857_v45  ;;  %246 = vst.msk [vmem:[#allocation2 + $0x2f8] sm:$0xff] %vm16_vm0, %v1857_v45  ;;  %v1806_v54 = vld [vmem:[%s3199_s0 + $0xe0] sm:$0xff]  ;;  %v1033_v56 = vld [vmem:[#allocation2 + $0x90] sm:$0xff]  ;;  %2203 = vmatmul.mubr.msk.f32.gmra.mrb[16].mxu0 %vm16_vm0, %v314_v50  ;;  %2314 = vmatmul.mubr.msk.f32.gmra.mrb[16].mxu1 %vm16_vm0, %v1073_v51 }
  0x31   :  { %47 = vst.msk [vmem:[#allocation2 + $0x60] sm:$0xff] %vm16_vm0, %v1804_v47  ;;  %120 = vst.msk [vmem:[#allocation2 + $0x270] sm:$0xff] %vm16_vm0, %v1804_v47  ;;  %v1860_v55 = vld [vmem:[%s3199_s0 + $0x260] sm:$0xff]  ;;  %v1807_v57 = vld [vmem:[%s3199_s0 + $0xe8] sm:$0xff]  ;;  %2215 = vmatprep.mubr.msk.f32.mxu0 %vm16_vm0, %v274_v52  ;;  %2326 = vmatprep.mubr.msk.f32.mxu1 %vm16_vm0, %v1033_v56 }
  0x32   :  { %178 = vst.msk [vmem:[#allocation2 + $0xf0] sm:$0xff] %vm16_vm0, %v1858_v48  ;;  %48 = vst.msk [vmem:[#allocation2 + $0x68] sm:$0xff] %vm16_vm0, %v1805_v49  ;;  %v1943_v58 = vld [vmem:[%s3198_s1 + $0x60] sm:$0xff]  ;;  %v1944_v59 = vld [vmem:[%s3198_s1 + $0x68] sm:$0xff] }
  0x33   :  { %249 = vst.msk [vmem:[#allocation2 + $0x300] sm:$0xff] %vm16_vm0, %v1858_v48  ;;  %121 = vst.msk [vmem:[#allocation2 + $0x278] sm:$0xff] %vm16_vm0, %v1805_v49  ;;  %v275_v60 = vld [vmem:[#allocation2 + $0x8] sm:$0xff]  ;;  %v1034_v61 = vld [vmem:[#allocation2 + $0x98] sm:$0xff]  ;;  %v2410_v1 = vpack.c.bf16 %v1944_v59, %v1943_v58 }
  0x34   :  { %179 = vst.msk [vmem:[#allocation2 + $0xf8] sm:$0xff] %vm16_vm0, %v1859_v53  ;;  %52 = vst.msk [vmem:[#allocation2 + $0x70] sm:$0xff] %vm16_vm0, %v1806_v54  ;;  %v1861_v62 = vld [vmem:[%s3199_s0 + $0x268] sm:$0xff]  ;;  %v1808_v63 = vld [vmem:[%s3199_s0 + $0x100] sm:$0xff]  ;;  %2216 = vmatmul.mubr.msk.f32.vlgmr.msra.gmra.mrb[0].mxu0 %vm16_vm0, %v275_v60  ;;  %2327 = vmatmul.mubr.msk.f32.vlgmr.msra.gmra.mrb[0].mxu1 %vm16_vm0, %v1034_v61 }
  0x35   :  { %183 = vst.msk [vmem:[#allocation2 + $0x100] sm:$0xff] %vm16_vm0, %v1860_v55  ;;  %250 = vst.msk [vmem:[#allocation2 + $0x308] sm:$0xff] %vm16_vm0, %v1859_v53  ;;  %v276_v0 = vld [vmem:[#allocation2 + $0x10] sm:$0xff]  ;;  %v1862_v2 = vld [vmem:[%s3199_s0 + $0x280] sm:$0xff]  ;;  %2409 = vmatpush3.bf16.msra.mxu0 %v2737_v9  ;;  %2433 = vmatpush3.bf16.msra.mxu1 %v2737_v9 }
  0x36   :  { %124 = vst.msk [vmem:[#allocation2 + $0x280] sm:$0xff] %vm16_vm0, %v1806_v54  ;;  %253 = vst.msk [vmem:[#allocation2 + $0x310] sm:$0xff] %vm16_vm0, %v1860_v55  ;;  %v1809_v3 = vld [vmem:[%s3199_s0 + $0x108] sm:$0xff]  ;;  %v1035_v4 = vld [vmem:[#allocation2 + $0xa0] sm:$0xff]  ;;  %2218 = vmatprep.mubr.msk.f32.mxu0 %vm16_vm0, %v276_v0  ;;  %2411 = vmatprep.subr.bf16.mxu0 %v2410_v1 }
  0x37   :  { %53 = vst.msk [vmem:[#allocation2 + $0x78] sm:$0xff] %vm16_vm0, %v1807_v57  ;;  %125 = vst.msk [vmem:[#allocation2 + $0x288] sm:$0xff] %vm16_vm0, %v1807_v57  ;;  %v1863_v5 = vld [vmem:[%s3199_s0 + $0x288] sm:$0xff]  ;;  %v277_v6 = vld [vmem:[#allocation2 + $0x18] sm:$0xff]  ;;  %2329 = vmatprep.mubr.msk.f32.mxu1 %vm16_vm0, %v1035_v4  ;;  %2435 = vmatprep.subr.bf16.mxu1 %v2410_v1 }
  0x38   :  { %184 = vst.msk [vmem:[#allocation2 + $0x108] sm:$0xff] %vm16_vm0, %v1861_v62  ;;  %57 = vst.msk [vmem:[#allocation2 + $0x80] sm:$0xff] %vm16_vm0, %v1808_v63  ;;  %v1036_v7 = vld [vmem:[#allocation2 + $0xa8] sm:$0xff]  ;;  %v278_v8 = vld [vmem:[#allocation2 + $0x20] sm:$0xff]  ;;  %2219 = vmatmul.mubr.msk.f32.gmra.mrb[2].mxu0 %vm16_vm0, %v277_v6 }
  0x39   :  { %254 = vst.msk [vmem:[#allocation2 + $0x318] sm:$0xff] %vm16_vm0, %v1861_v62  ;;  %128 = vst.msk [vmem:[#allocation2 + $0x290] sm:$0xff] %vm16_vm0, %v1808_v63  ;;  %v1037_v10 = vld [vmem:[#allocation2 + $0xb0] sm:$0xff]  ;;  %2330 = vmatmul.mubr.msk.f32.gmra.mrb[2].mxu1 %vm16_vm0, %v1036_v7  ;;  %2221 = vmatprep.mubr.msk.f32.mxu0 %vm16_vm0, %v278_v8  ;;  %v279_v9 = vld [vmem:[#allocation2 + $0x28] sm:$0xff] }
  0x3a   :  { %188 = vst.msk [vmem:[#allocation2 + $0x110] sm:$0xff] %vm16_vm0, %v1862_v2  ;;  %58 = vst.msk [vmem:[#allocation2 + $0x88] sm:$0xff] %vm16_vm0, %v1809_v3  ;;  %v1945_v11 = vld [vmem:[%s3198_s1 + $0x70] sm:$0xff]  ;;  %2332 = vmatprep.mubr.msk.f32.mxu1 %vm16_vm0, %v1037_v10  ;;  %v1038_v12 = vld [vmem:[#allocation2 + $0xb8] sm:$0xff]  ;;  %2413 = vmatpush3.bf16.msra.mxu0 %v2410_v1 }
  0x3b   :  { %257 = vst.msk [vmem:[#allocation2 + $0x320] sm:$0xff] %vm16_vm0, %v1862_v2  ;;  %129 = vst.msk [vmem:[#allocation2 + $0x298] sm:$0xff] %vm16_vm0, %v1809_v3  ;;  %v280_v13 = vld [vmem:[#allocation2 + $0x30] sm:$0xff]  ;;  %v1039_v14 = vld [vmem:[#allocation2 + $0xc0] sm:$0xff]  ;;  %2437 = vmatpush3.bf16.msra.mxu1 %v2410_v1  ;;  %2250 = vmatprep.subr.mxu0 %v1945_v11 }
  0x3c   :  { %189 = vst.msk [vmem:[#allocation2 + $0x118] sm:$0xff] %vm16_vm0, %v1863_v5  ;;  %258 = vst.msk [vmem:[#allocation2 + $0x328] sm:$0xff] %vm16_vm0, %v1863_v5  ;;  %2222 = vmatmul.mubr.msk.f32.gmra.mrb[4].mxu0 %vm16_vm0, %v279_v9  ;;  %2361 = vmatprep.subr.mxu1 %v1945_v11  ;;  %v281_v15 = vld [vmem:[#allocation2 + $0x38] sm:$0xff]  ;;  %v1040_v16 = vld [vmem:[#allocation2 + $0xc8] sm:$0xff] }
  0x3d   :  { %2333 = vmatmul.mubr.msk.f32.gmra.mrb[4].mxu1 %vm16_vm0, %v1038_v12  ;;  %2224 = vmatprep.mubr.msk.f32.mxu0 %vm16_vm0, %v280_v13  ;;  %v282_v17 = vld [vmem:[#allocation2 + $0x40] sm:$0xff]  ;;  %v1041_v18 = vld [vmem:[#allocation2 + $0xd0] sm:$0xff]  ;;  %v283_v19 = vld [vmem:[#allocation2 + $0x48] sm:$0xff] }
  0x3e   :  { %2335 = vmatprep.mubr.msk.f32.mxu1 %vm16_vm0, %v1039_v14  ;;  %2251 = vmatpush3.msra.mxu0 %v1945_v11  ;;  %v1042_v20 = vld [vmem:[#allocation2 + $0xd8] sm:$0xff]  ;;  %v284_v21 = vld [vmem:[#allocation2 + $0x50] sm:$0xff]  ;;  %v1840_v22 = vld [vmem:[%s3199_s0 + $0x120] sm:$0xff] }
  0x3f   :  { %2362 = vmatpush3.msra.mxu1 %v1945_v11  ;;  %v1894_v23 = vld [vmem:[%s3199_s0 + $0x2a0] sm:$0xff]  ;;  %v1841_v24 = vld [vmem:[%s3199_s0 + $0x128] sm:$0xff]  ;;  %133 = vst.msk [vmem:[#allocation2 + $0x2a0] sm:$0xff] %vm16_vm0, %v1840_v22  ;;  %v285_v35 = vld [vmem:[#allocation2 + $0x58] sm:$0xff] }
  0x40   :  { %2225 = vmatmul.mubr.msk.f32.gmra.mrb[6].mxu0 %vm16_vm0, %v281_v15  ;;  %v1043_v25 = vld [vmem:[#allocation2 + $0xe0] sm:$0xff]  ;;  %262 = vst.msk [vmem:[#allocation2 + $0x330] sm:$0xff] %vm16_vm0, %v1894_v23  ;;  %134 = vst.msk [vmem:[#allocation2 + $0x2a8] sm:$0xff] %vm16_vm0, %v1841_v24  ;;  %v1895_v26 = vld [vmem:[%s3199_s0 + $0x2a8] sm:$0xff] }
  0x41   :  { %2336 = vmatmul.mubr.msk.f32.gmra.mrb[6].mxu1 %vm16_vm0, %v1040_v16  ;;  %2227 = vmatprep.mubr.msk.f32.mxu0 %vm16_vm0, %v282_v17  ;;  %v1842_v27 = vld [vmem:[%s3199_s0 + $0x140] sm:$0xff]  ;;  %263 = vst.msk [vmem:[#allocation2 + $0x338] sm:$0xff] %vm16_vm0, %v1895_v26  ;;  %v1843_v29 = vld [vmem:[%s3199_s0 + $0x148] sm:$0xff]  ;;  %v1045_v38 = vld [vmem:[#allocation2 + $0xf0] sm:$0xff] }
  0x42   :  { %v1896_v28 = vld [vmem:[%s3199_s0 + $0x2c0] sm:$0xff]  ;;  %2338 = vmatprep.mubr.msk.f32.mxu1 %vm16_vm0, %v1041_v18  ;;  %138 = vst.msk [vmem:[#allocation2 + $0x2b0] sm:$0xff] %vm16_vm0, %v1842_v27  ;;  %v1897_v30 = vld [vmem:[%s3199_s0 + $0x2c8] sm:$0xff]  ;;  %139 = vst.msk [vmem:[#allocation2 + $0x2b8] sm:$0xff] %vm16_vm0, %v1843_v29 }
  0x43   :  { %267 = vst.msk [vmem:[#allocation2 + $0x340] sm:$0xff] %vm16_vm0, %v1896_v28  ;;  %v1844_v31 = vld [vmem:[%s3199_s0 + $0x160] sm:$0xff]  ;;  %268 = vst.msk [vmem:[#allocation2 + $0x348] sm:$0xff] %vm16_vm0, %v1897_v30  ;;  %v1845_v33 = vld [vmem:[%s3199_s0 + $0x168] sm:$0xff] }
  0x44   :  { %143 = vst.msk [vmem:[#allocation2 + $0x2c0] sm:$0xff] %vm16_vm0, %v1844_v31  ;;  %v1898_v32 = vld [vmem:[%s3199_s0 + $0x2e0] sm:$0xff]  ;;  %v1899_v34 = vld [vmem:[%s3199_s0 + $0x2e8] sm:$0xff]  ;;  %2228 = vmatmul.mubr.msk.f32.gmra.mrb[8].mxu0 %vm16_vm0, %v283_v19  ;;  %144 = vst.msk [vmem:[#allocation2 + $0x2c8] sm:$0xff] %vm16_vm0, %v1845_v33 }
  0x45   :  { %272 = vst.msk [vmem:[#allocation2 + $0x350] sm:$0xff] %vm16_vm0, %v1898_v32  ;;  %273 = vst.msk [vmem:[#allocation2 + $0x358] sm:$0xff] %vm16_vm0, %v1899_v34  ;;  %2339 = vmatmul.mubr.msk.f32.gmra.mrb[8].mxu1 %vm16_vm0, %v1042_v20  ;;  %2230 = vmatprep.mubr.msk.f32.mxu0 %vm16_vm0, %v284_v21  ;;  %v1044_v36 = vld [vmem:[#allocation2 + $0xe8] sm:$0xff]  ;;  %v286_v37 = vld [vmem:[#allocation2 + $0x60] sm:$0xff] }
  0x46   :  { %2341 = vmatprep.mubr.msk.f32.mxu1 %vm16_vm0, %v1043_v25  ;;  %v287_v39 = vld [vmem:[#allocation2 + $0x68] sm:$0xff]  ;;  %v1046_v40 = vld [vmem:[#allocation2 + $0xf8] sm:$0xff]  ;;  %v288_v41 = vld [vmem:[#allocation2 + $0x70] sm:$0xff] }
  0x47   :  { %v1047_v42 = vld [vmem:[#allocation2 + $0x100] sm:$0xff]  ;;  %v289_v43 = vld [vmem:[#allocation2 + $0x78] sm:$0xff]  ;;  %v1048_v44 = vld [vmem:[#allocation2 + $0x108] sm:$0xff] }
  0x48   :  { %2231 = vmatmul.mubr.msk.f32.gmra.mrb[10].mxu0 %vm16_vm0, %v285_v35  ;;  %v290_v45 = vld [vmem:[#allocation2 + $0x80] sm:$0xff]  ;;  %v1049_v46 = vld [vmem:[#allocation2 + $0x110] sm:$0xff]  ;;  %v291_v47 = vld [vmem:[#allocation2 + $0x88] sm:$0xff] }
  0x49   :  { %2342 = vmatmul.mubr.msk.f32.gmra.mrb[10].mxu1 %vm16_vm0, %v1044_v36  ;;  %2233 = vmatprep.mubr.msk.f32.mxu0 %vm16_vm0, %v286_v37  ;;  %v1050_v48 = vld [vmem:[#allocation2 + $0x118] sm:$0xff]  ;;  %v739_v49 = vld [vmem:[#allocation2 + $0x240] sm:$0xff]  ;;  %v1497_v50 = vld [vmem:[#allocation2 + $0x2d0] sm:$0xff] }
  0x4a   :  { %2344 = vmatprep.mubr.msk.f32.mxu1 %vm16_vm0, %v1045_v38  ;;  %v740_v51 = vld [vmem:[#allocation2 + $0x248] sm:$0xff]  ;;  %v1498_v52 = vld [vmem:[#allocation2 + $0x2d8] sm:$0xff]  ;;  %v741_v53 = vld [vmem:[#allocation2 + $0x250] sm:$0xff] }
  0x4b   :  { %v1499_v54 = vld [vmem:[#allocation2 + $0x2e0] sm:$0xff]  ;;  %v742_v55 = vld [vmem:[#allocation2 + $0x258] sm:$0xff]  ;;  %v1500_v56 = vld [vmem:[#allocation2 + $0x2e8] sm:$0xff] }
  0x4c   :  { %2234 = vmatmul.mubr.msk.f32.gmra.mrb[12].mxu0 %vm16_vm0, %v287_v39  ;;  %v743_v57 = vld [vmem:[#allocation2 + $0x260] sm:$0xff]  ;;  %v1501_v58 = vld [vmem:[#allocation2 + $0x2f0] sm:$0xff]  ;;  %v744_v59 = vld [vmem:[#allocation2 + $0x268] sm:$0xff] }
  0x4d   :  { %2345 = vmatmul.mubr.msk.f32.gmra.mrb[12].mxu1 %vm16_vm0, %v1046_v40  ;;  %2236 = vmatprep.mubr.msk.f32.mxu0 %vm16_vm0, %v288_v41  ;;  %v1502_v60 = vld [vmem:[#allocation2 + $0x2f8] sm:$0xff]  ;;  %v745_v61 = vld [vmem:[#allocation2 + $0x270] sm:$0xff]  ;;  %v1503_v62 = vld [vmem:[#allocation2 + $0x300] sm:$0xff] }
  0x4e   :  { %2347 = vmatprep.mubr.msk.f32.mxu1 %vm16_vm0, %v1047_v42  ;;  %v746_v63 = vld [vmem:[#allocation2 + $0x278] sm:$0xff]  ;;  %v1504_v0 = vld [vmem:[#allocation2 + $0x308] sm:$0xff]  ;;  %v747_v1 = vld [vmem:[#allocation2 + $0x280] sm:$0xff] }
  0x4f   :  { %v1505_v2 = vld [vmem:[#allocation2 + $0x310] sm:$0xff]  ;;  %v748_v3 = vld [vmem:[#allocation2 + $0x288] sm:$0xff]  ;;  %v1506_v4 = vld [vmem:[#allocation2 + $0x318] sm:$0xff] }
  0x50   :  { %2237 = vmatmul.mubr.msk.f32.gmra.mrb[14].mxu0 %vm16_vm0, %v289_v43  ;;  %v749_v5 = vld [vmem:[#allocation2 + $0x290] sm:$0xff]  ;;  %v1507_v6 = vld [vmem:[#allocation2 + $0x320] sm:$0xff]  ;;  %v750_v7 = vld [vmem:[#allocation2 + $0x298] sm:$0xff] }
  0x51   :  { %2348 = vmatmul.mubr.msk.f32.gmra.mrb[14].mxu1 %vm16_vm0, %v1048_v44  ;;  %2239 = vmatprep.mubr.msk.f32.mxu0 %vm16_vm0, %v290_v45  ;;  %v1508_v8 = vld [vmem:[#allocation2 + $0x328] sm:$0xff]  ;;  %v751_v10 = vld [vmem:[#allocation2 + $0x2a0] sm:$0xff]  ;;  %v1509_v11 = vld [vmem:[#allocation2 + $0x330] sm:$0xff] }
  0x52   :  { %2350 = vmatprep.mubr.msk.f32.mxu1 %vm16_vm0, %v1049_v46  ;;  %v752_v9 = vld [vmem:[#allocation2 + $0x2a8] sm:$0xff]  ;;  %v1510_v12 = vld [vmem:[#allocation2 + $0x338] sm:$0xff]  ;;  %v753_v13 = vld [vmem:[#allocation2 + $0x2b0] sm:$0xff] }
  0x53   :  { %v1511_v14 = vld [vmem:[#allocation2 + $0x340] sm:$0xff]  ;;  %v754_v15 = vld [vmem:[#allocation2 + $0x2b8] sm:$0xff]  ;;  %v1512_v16 = vld [vmem:[#allocation2 + $0x348] sm:$0xff] }
  0x54   :  { %2240 = vmatmul.mubr.msk.f32.gmra.mrb[16].mxu0 %vm16_vm0, %v291_v47  ;;  %v755_v17 = vld [vmem:[#allocation2 + $0x2c0] sm:$0xff]  ;;  %v1513_v18 = vld [vmem:[#allocation2 + $0x350] sm:$0xff]  ;;  %v756_v19 = vld [vmem:[#allocation2 + $0x2c8] sm:$0xff] }
  0x55   :  { %2351 = vmatmul.mubr.msk.f32.gmra.mrb[16].mxu1 %vm16_vm0, %v1050_v48  ;;  %2252 = vmatprep.mubr.msk.f32.mxu0 %vm16_vm0, %v739_v49  ;;  %v1514_v20 = vld [vmem:[#allocation2 + $0x358] sm:$0xff]  ;;  %v3052_v21 = vld [vmem:[%s3200_s2] ss:$0 sm:$0xff] }
  0x56   :  { %2363 = vmatprep.mubr.msk.f32.mxu1 %vm16_vm0, %v1497_v50 }
  0x58   :  { %2253 = vmatmul.mubr.msk.f32.vlgmr.msra.gmra.mrb[0].mxu0 %vm16_vm0, %v740_v51 }
  0x59   :  { %2364 = vmatmul.mubr.msk.f32.vlgmr.msra.gmra.mrb[0].mxu1 %vm16_vm0, %v1498_v52  ;;  %2255 = vmatprep.mubr.msk.f32.mxu0 %vm16_vm0, %v741_v53 }
  0x5a   :  { %2366 = vmatprep.mubr.msk.f32.mxu1 %vm16_vm0, %v1499_v54 }
  0x5c   :  { %2256 = vmatmul.mubr.msk.f32.gmra.mrb[2].mxu0 %vm16_vm0, %v742_v55 }
  0x5d   :  { %2367 = vmatmul.mubr.msk.f32.gmra.mrb[2].mxu1 %vm16_vm0, %v1500_v56  ;;  %2258 = vmatprep.mubr.msk.f32.mxu0 %vm16_vm0, %v743_v57 }
  0x5e   :  { %2369 = vmatprep.mubr.msk.f32.mxu1 %vm16_vm0, %v1501_v58 }
  0x60   :  { %2259 = vmatmul.mubr.msk.f32.gmra.mrb[4].mxu0 %vm16_vm0, %v744_v59 }
  0x61   :  { %2370 = vmatmul.mubr.msk.f32.gmra.mrb[4].mxu1 %vm16_vm0, %v1502_v60  ;;  %2261 = vmatprep.mubr.msk.f32.mxu0 %vm16_vm0, %v745_v61 }
  0x62   :  { %2372 = vmatprep.mubr.msk.f32.mxu1 %vm16_vm0, %v1503_v62 }
  0x64   :  { %2262 = vmatmul.mubr.msk.f32.gmra.mrb[6].mxu0 %vm16_vm0, %v746_v63 }
  0x65   :  { %2373 = vmatmul.mubr.msk.f32.gmra.mrb[6].mxu1 %vm16_vm0, %v1504_v0  ;;  %2264 = vmatprep.mubr.msk.f32.mxu0 %vm16_vm0, %v747_v1 }
  0x66   :  { %2375 = vmatprep.mubr.msk.f32.mxu1 %vm16_vm0, %v1505_v2 }
  0x68   :  { %2265 = vmatmul.mubr.msk.f32.gmra.mrb[8].mxu0 %vm16_vm0, %v748_v3 }
  0x69   :  { %2376 = vmatmul.mubr.msk.f32.gmra.mrb[8].mxu1 %vm16_vm0, %v1506_v4  ;;  %2267 = vmatprep.mubr.msk.f32.mxu0 %vm16_vm0, %v749_v5 }
  0x6a   :  { %2378 = vmatprep.mubr.msk.f32.mxu1 %vm16_vm0, %v1507_v6 }
  0x6c   :  { %2268 = vmatmul.mubr.msk.f32.gmra.mrb[10].mxu0 %vm16_vm0, %v750_v7 }
  0x6d   :  { %2379 = vmatmul.mubr.msk.f32.gmra.mrb[10].mxu1 %vm16_vm0, %v1508_v8  ;;  %2270 = vmatprep.mubr.msk.f32.mxu0 %vm16_vm0, %v751_v10 }
  0x6e   :  { %2381 = vmatprep.mubr.msk.f32.mxu1 %vm16_vm0, %v1509_v11 }
  0x70   :  { %2271 = vmatmul.mubr.msk.f32.gmra.mrb[12].mxu0 %vm16_vm0, %v752_v9 }
  0x71   :  { %2382 = vmatmul.mubr.msk.f32.gmra.mrb[12].mxu1 %vm16_vm0, %v1510_v12  ;;  %2273 = vmatprep.mubr.msk.f32.mxu0 %vm16_vm0, %v753_v13 }
  0x72   :  { %2384 = vmatprep.mubr.msk.f32.mxu1 %vm16_vm0, %v1511_v14 }
  0x74   :  { %2274 = vmatmul.mubr.msk.f32.gmra.mrb[14].mxu0 %vm16_vm0, %v754_v15 }
  0x75   :  { %2385 = vmatmul.mubr.msk.f32.gmra.mrb[14].mxu1 %vm16_vm0, %v1512_v16  ;;  %2276 = vmatprep.mubr.msk.f32.mxu0 %vm16_vm0, %v755_v17 }
  0x76   :  { %2387 = vmatprep.mubr.msk.f32.mxu1 %vm16_vm0, %v1513_v18 }
  0x78   :  { %2277 = vmatmul.mubr.msk.f32.gmra.mrb[16].mxu0 %vm16_vm0, %v756_v19 }
  0x79   :  { %2388 = vmatmul.mubr.msk.f32.gmra.mrb[16].mxu1 %vm16_vm0, %v1514_v20 }
 0x12b   :  { %v2254_v22 = vpop.f32.mrb[0].mxu0 }
 0x12c   :  { %v998_v23 = vadd.f32 %v2254_v22, %v3052_v21  ;;  %v2365_v24 = vpop.f32.mrb[0].mxu1  ;;  %v883_v25 = vpop.f32.mrb[1].mxu0 }
 0x12d   :  { %v1755_v26 = vadd.f32 %v2365_v24, %v3052_v21  ;;  %v997_v27 = vadd.f32 %v3052_v21, %v883_v25  ;;  %v1640_v28 = vpop.f32.mrb[1].mxu1 }
 0x12e   :  { %1016 = vst [vmem:[%s3201_s3 + $0x8] sm:$0xff] %v998_v23  ;;  %v1754_v29 = vadd.f32 %v3052_v21, %v1640_v28 }
 0x12f   :  { %1773 = vst [vmem:[%s3201_s3 + $0x98] sm:$0xff] %v1755_v26  ;;  %1015 = vst [vmem:[%s3201_s3] sm:$0xff] %v997_v27  ;;  %v2257_v30 = vpop.f32.mrb[2].mxu0 }
 0x130   :  { %1772 = vst [vmem:[%s3201_s3 + $0x90] sm:$0xff] %v1754_v29  ;;  %v1000_v31 = vadd.f32 %v2257_v30, %v3052_v21  ;;  %v2368_v32 = vpop.f32.mrb[2].mxu1  ;;  %v893_v33 = vpop.f32.mrb[3].mxu0 }
 0x131   :  { %v1757_v34 = vadd.f32 %v2368_v32, %v3052_v21  ;;  %v999_v35 = vadd.f32 %v3052_v21, %v893_v33  ;;  %v1650_v36 = vpop.f32.mrb[3].mxu1 }
 0x132   :  { %1018 = vst [vmem:[%s3201_s3 + $0x18] sm:$0xff] %v1000_v31  ;;  %v1756_v37 = vadd.f32 %v3052_v21, %v1650_v36 }
 0x133   :  { %1775 = vst [vmem:[%s3201_s3 + $0xa8] sm:$0xff] %v1757_v34  ;;  %1017 = vst [vmem:[%s3201_s3 + $0x10] sm:$0xff] %v999_v35  ;;  %v2260_v38 = vpop.f32.mrb[4].mxu0 }
 0x134   :  { %1774 = vst [vmem:[%s3201_s3 + $0xa0] sm:$0xff] %v1756_v37  ;;  %v1002_v39 = vadd.f32 %v2260_v38, %v3052_v21  ;;  %v2371_v40 = vpop.f32.mrb[4].mxu1  ;;  %v903_v41 = vpop.f32.mrb[5].mxu0 }
 0x135   :  { %v1759_v42 = vadd.f32 %v2371_v40, %v3052_v21  ;;  %v1001_v43 = vadd.f32 %v3052_v21, %v903_v41  ;;  %v1660_v44 = vpop.f32.mrb[5].mxu1 }
 0x136   :  { %1020 = vst [vmem:[%s3201_s3 + $0x28] sm:$0xff] %v1002_v39  ;;  %v1758_v45 = vadd.f32 %v3052_v21, %v1660_v44 }
 0x137   :  { %1777 = vst [vmem:[%s3201_s3 + $0xb8] sm:$0xff] %v1759_v42  ;;  %1019 = vst [vmem:[%s3201_s3 + $0x20] sm:$0xff] %v1001_v43  ;;  %v2263_v46 = vpop.f32.mrb[6].mxu0 }
 0x138   :  { %1776 = vst [vmem:[%s3201_s3 + $0xb0] sm:$0xff] %v1758_v45  ;;  %v1004_v47 = vadd.f32 %v2263_v46, %v3052_v21  ;;  %v2374_v48 = vpop.f32.mrb[6].mxu1  ;;  %v913_v49 = vpop.f32.mrb[7].mxu0 }
 0x139   :  { %v1761_v50 = vadd.f32 %v2374_v48, %v3052_v21  ;;  %v1003_v51 = vadd.f32 %v3052_v21, %v913_v49  ;;  %v1670_v52 = vpop.f32.mrb[7].mxu1 }
 0x13a   :  { %1022 = vst [vmem:[%s3201_s3 + $0x38] sm:$0xff] %v1004_v47  ;;  %v1760_v53 = vadd.f32 %v3052_v21, %v1670_v52 }
 0x13b   :  { %1779 = vst [vmem:[%s3201_s3 + $0xc8] sm:$0xff] %v1761_v50  ;;  %1021 = vst [vmem:[%s3201_s3 + $0x30] sm:$0xff] %v1003_v51  ;;  %v2266_v54 = vpop.f32.mrb[8].mxu0 }
 0x13c   :  { %1778 = vst [vmem:[%s3201_s3 + $0xc0] sm:$0xff] %v1760_v53  ;;  %v1006_v55 = vadd.f32 %v2266_v54, %v3052_v21  ;;  %v2377_v56 = vpop.f32.mrb[8].mxu1  ;;  %v923_v57 = vpop.f32.mrb[9].mxu0 }
 0x13d   :  { %v1763_v58 = vadd.f32 %v2377_v56, %v3052_v21  ;;  %v1005_v59 = vadd.f32 %v3052_v21, %v923_v57  ;;  %v1680_v60 = vpop.f32.mrb[9].mxu1 }
 0x13e   :  { %1024 = vst [vmem:[%s3201_s3 + $0x48] sm:$0xff] %v1006_v55  ;;  %v1762_v61 = vadd.f32 %v3052_v21, %v1680_v60 }
 0x13f   :  { %1781 = vst [vmem:[%s3201_s3 + $0xd8] sm:$0xff] %v1763_v58  ;;  %1023 = vst [vmem:[%s3201_s3 + $0x40] sm:$0xff] %v1005_v59  ;;  %v2269_v62 = vpop.f32.mrb[10].mxu0 }
 0x140   :  { %1780 = vst [vmem:[%s3201_s3 + $0xd0] sm:$0xff] %v1762_v61  ;;  %v1008_v63 = vadd.f32 %v2269_v62, %v3052_v21  ;;  %v2380_v0 = vpop.f32.mrb[10].mxu1  ;;  %v933_v1 = vpop.f32.mrb[11].mxu0 }
 0x141   :  { %v1765_v2 = vadd.f32 %v2380_v0, %v3052_v21  ;;  %v1007_v3 = vadd.f32 %v3052_v21, %v933_v1  ;;  %v1690_v4 = vpop.f32.mrb[11].mxu1 }
 0x142   :  { %1026 = vst [vmem:[%s3201_s3 + $0x58] sm:$0xff] %v1008_v63  ;;  %v1764_v5 = vadd.f32 %v3052_v21, %v1690_v4 }
 0x143   :  { %1783 = vst [vmem:[%s3201_s3 + $0xe8] sm:$0xff] %v1765_v2  ;;  %1025 = vst [vmem:[%s3201_s3 + $0x50] sm:$0xff] %v1007_v3  ;;  %v2272_v6 = vpop.f32.mrb[12].mxu0 }
 0x144   :  { %1782 = vst [vmem:[%s3201_s3 + $0xe0] sm:$0xff] %v1764_v5  ;;  %v1010_v7 = vadd.f32 %v2272_v6, %v3052_v21  ;;  %v2383_v8 = vpop.f32.mrb[12].mxu1  ;;  %v943_v10 = vpop.f32.mrb[13].mxu0 }
 0x145   :  { %v1767_v11 = vadd.f32 %v2383_v8, %v3052_v21  ;;  %v1009_v9 = vadd.f32 %v3052_v21, %v943_v10  ;;  %v1700_v12 = vpop.f32.mrb[13].mxu1 }
 0x146   :  { %1028 = vst [vmem:[%s3201_s3 + $0x68] sm:$0xff] %v1010_v7  ;;  %v1766_v13 = vadd.f32 %v3052_v21, %v1700_v12 }
 0x147   :  { %1785 = vst [vmem:[%s3201_s3 + $0xf8] sm:$0xff] %v1767_v11  ;;  %1027 = vst [vmem:[%s3201_s3 + $0x60] sm:$0xff] %v1009_v9  ;;  %v2275_v14 = vpop.f32.mrb[14].mxu0 }
 0x148   :  { %1784 = vst [vmem:[%s3201_s3 + $0xf0] sm:$0xff] %v1766_v13  ;;  %v1012_v15 = vadd.f32 %v2275_v14, %v3052_v21  ;;  %v2386_v16 = vpop.f32.mrb[14].mxu1  ;;  %v953_v17 = vpop.f32.mrb[15].mxu0 }
 0x149   :  { %v1769_v18 = vadd.f32 %v2386_v16, %v3052_v21  ;;  %v1011_v19 = vadd.f32 %v3052_v21, %v953_v17  ;;  %v1710_v20 = vpop.f32.mrb[15].mxu1 }
 0x14a   :  { %1030 = vst [vmem:[%s3201_s3 + $0x78] sm:$0xff] %v1012_v15  ;;  %v1768_v22 = vadd.f32 %v3052_v21, %v1710_v20 }
 0x14b   :  { %1787 = vst [vmem:[%s3201_s3 + $0x108] sm:$0xff] %v1769_v18  ;;  %1029 = vst [vmem:[%s3201_s3 + $0x70] sm:$0xff] %v1011_v19  ;;  %v2278_v23 = vpop.f32.mrb[16].mxu0 }
 0x14c   :  { %1786 = vst [vmem:[%s3201_s3 + $0x100] sm:$0xff] %v1768_v22  ;;  %v1014_v24 = vadd.f32 %v2278_v23, %v3052_v21  ;;  %v2389_v25 = vpop.f32.mrb[16].mxu1  ;;  %v963_v26 = vpop.f32.mrb[17].mxu0 }
 0x14d   :  { %v1771_v27 = vadd.f32 %v2389_v25, %v3052_v21  ;;  %v1013_v28 = vadd.f32 %v3052_v21, %v963_v26  ;;  %v1720_v29 = vpop.f32.mrb[17].mxu1 }
 0x14e   :  { %1032 = vst [vmem:[%s3201_s3 + $0x88] sm:$0xff] %v1014_v24  ;;  %v1770_v30 = vadd.f32 %v3052_v21, %v1720_v29 }
 0x14f   :  { %1789 = vst [vmem:[%s3201_s3 + $0x118] sm:$0xff] %v1771_v27  ;;  %1031 = vst [vmem:[%s3201_s3 + $0x80] sm:$0xff] %v1013_v28 }
 0x150   :  { %1788 = vst [vmem:[%s3201_s3 + $0x110] sm:$0xff] %v1770_v30 }

</bundles_post_ra>
